<compile_context>
chip_gen: v5e
topology: v5e:2x2
jax: 0.10.0
libtpu: 0.0.40
codegen_flags: <defaults>
</compile_context>

<pallas_src>
import jax
import jax.numpy as jnp
from jax.experimental import pallas as pl
from jax.experimental.pallas import tpu as pltpu


def _fused_deconv_kernel(x_ref, e_ref, wpat_ref, bpat_ref, o_ref):
    """One (batch, row-tile) grid step.

    x_ref   : (Cin, TH, W)      input rows of this tile (native layout, no pre-transpose)
    e_ref   : (W, 16W)          constant 0/1 lane-expansion matrix (w -> a*4W + 4w + b)
    wpat_ref: (Cin*Cout, 16W)   W_eff replicated into the super-row lane pattern
    bpat_ref: (Cout, 16W)       fused bias in the super-row lane pattern
    o_ref   : (Cout, TH, 16W)   super-rows == final (4H, 4W) layout, lane-dense stores
    """
    cin, th, _ = x_ref.shape
    cout, _, lanes = o_ref.shape

    e = e_ref[...]
    accs = [jnp.broadcast_to(bpat_ref[co:co + 1, :], (th, lanes)) for co in range(cout)]
    for ci in range(cin):
        # MXU used purely for the sub-pixel lane interleave; E is 0/1 so this is an
        # (essentially exact) copy of x into the interleaved lane order.
        x_rep = jnp.dot(x_ref[ci], e, preferred_element_type=jnp.float32)
        for co in range(cout):
            row = ci * cout + co
            accs[co] = accs[co] + x_rep * wpat_ref[row:row + 1, :]
    for co in range(cout):
        o_ref[co, :, :] = accs[co].astype(o_ref.dtype)


def fuse_weights(w2, b2, w1, b1):
    """Compose two ConvTranspose2d(k=2, s=2, p=0) layers into one k=4, s=4 layer."""
    cin = w2.shape[0]
    cout = w1.shape[1]
    w2f, w1f = w2.astype(jnp.float32), w1.astype(jnp.float32)
    b2f, b1f = b2.astype(jnp.float32), b1.astype(jnp.float32)
    # (ci, co, a2, a1, b2, b1) -> (ci, co, a = 2*a2 + a1, b = 2*b2 + b1)
    w_eff = jnp.einsum("imab,mocd->ioacbd", w2f, w1f).reshape(cin, cout, 4, 4)
    bias_sub = jnp.einsum("m,mocd->ocd", b2f, w1f)                    # (cout, 2, 2) over (a%2, b%2)
    bias_eff = bias_sub[:, None, :, None, :] + b1f[:, None, None, None, None]
    bias_eff = jnp.broadcast_to(bias_eff, (cout, 2, 2, 2, 2)).reshape(cout, 4, 4)
    return w_eff, bias_eff


def make_lane_operands(w_eff, bias_eff, width):
    """Per-image-width kernel operands. Precompute ONCE per shape (not per forward)."""
    cin, cout = w_eff.shape[0], w_eff.shape[1]
    lanes = 16 * width
    lane = jnp.arange(lanes, dtype=jnp.int32)
    a_idx = lane // (4 * width)          # output sub-row   a in [0, 4)
    w_idx = (lane // 4) % width          # source column    w in [0, W)
    b_idx = lane % 4                     # output sub-col   b in [0, 4)
    e_mat = (jnp.arange(width, dtype=jnp.int32)[:, None] == w_idx[None, :]).astype(jnp.float32)
    wpat = w_eff[:, :, a_idx, b_idx].reshape(cin * cout, lanes).astype(jnp.float32)
    bpat = bias_eff[:, a_idx, b_idx].reshape(cout, lanes).astype(jnp.float32)
    return e_mat, wpat, bpat


def _pick_row_tile(h, width):
    """Largest multiple-of-8 divisor of h giving ~<=2 MiB output blocks (or h itself)."""
    if h % 8 != 0:
        return h                          # full-extent block is always legal
    row_bytes = 16 * width * 4
    target = max(8, min(h, ((2 << 20) // max(row_bytes, 1)) // 8 * 8))
    th = 8
    for cand in range(8, h + 1, 8):
        if h % cand == 0 and cand <= target:
            th = cand
    return th


def fused_conv_transpose_chain(x, e_mat, wpat, bpat):
    """x: (N, Cin, H, W) f32 -> (N, Cout, 4H, 4W) f32, single pallas_call."""
    n, cin, h, w = x.shape
    cout = bpat.shape[0]
    lanes = 16 * w
    th = _pick_row_tile(h, w)
    assert h % th == 0
    grid = (n, h // th)

    # Double-buffered per-step VMEM footprint (x, out) + resident operands.
    vmem_need = 4 * (2 * cin * th * w + 2 * cout * th * lanes
                     + 2 * w * lanes + 2 * (cin * cout + cout) * lanes)
    vmem_limit = int(min(max(4 * vmem_need, 16 << 20), 32 << 20))

    out_view = pl.pallas_call(
        _fused_deconv_kernel,
        out_shape=jax.ShapeDtypeStruct((n, cout, h, lanes), x.dtype),
        grid=grid,
        in_specs=[
            pl.BlockSpec((None, cin, th, w), lambda ni, ti: (ni, 0, ti, 0)),
            pl.BlockSpec((w, lanes), lambda ni, ti: (0, 0)),
            pl.BlockSpec((cin * cout, lanes), lambda ni, ti: (0, 0)),
            pl.BlockSpec((cout, lanes), lambda ni, ti: (0, 0)),
        ],
        out_specs=pl.BlockSpec((None, cout, th, lanes), lambda ni, ti: (ni, 0, ti, 0)),
        compiler_params=pltpu.CompilerParams(
            dimension_semantics=("parallel", "parallel"),
            vmem_limit_bytes=vmem_limit,
        ),
    )(x, e_mat, wpat, bpat)

    # (N, Cout, H, 16W) and (N, Cout, 4H, 4W) share the same row-major layout:
    # this reshape is a free bitcast, not an HBM copy.
    return out_view.reshape(n, cout, 4 * h, 4 * w)


def model_forward(x, params):
    """Mirrors Model.forward: v1 = conv_transpose_2(x); v2 = conv_transpose_1(v1)."""
    w2, b2, w1, b1 = params
    w_eff, bias_eff = fuse_weights(w2, b2, w1, b1)
    e_mat, wpat, bpat = make_lane_operands(w_eff, bias_eff, x.shape[-1])
    return fused_conv_transpose_chain(x, e_mat, wpat, bpat)


def _ref_convt(x, weight, bias):
    """Pure-JAX reference of a single ConvTranspose2d(k=2, s=2, p=0)."""
    n, cin, h, w = x.shape
    cout = weight.shape[1]
    out = jnp.zeros((n, cout, 2 * h, 2 * w), x.dtype)
    for di in range(2):
        for dj in range(2):
            y = jnp.einsum("nchw,co->nohw", x, weight[:, :, di, dj]) + bias[None, :, None, None]
            out = out.at[:, :, di::2, dj::2].set(y)
    return out


if __name__ == "__main__":
    key = jax.random.PRNGKey(0)
    kx, kw2, kb2, kw1, kb1 = jax.random.split(key, 5)

    # Shapes of the original module: x1 = torch.randn(2, 2, 64, 64).
    x = jax.random.normal(kx, (2, 2, 64, 64), dtype=jnp.float32)

    # conv_transpose_2: in=2 -> out=1, k=2, s=2
    w2 = jax.random.normal(kw2, (2, 1, 2, 2), dtype=jnp.float32) * 0.5
    b2 = jax.random.normal(kb2, (1,), dtype=jnp.float32) * 0.1
    # conv_transpose_1 (adapted to in=1 -> out=1; see TODO at top)
    w1 = jax.random.normal(kw1, (1, 1, 2, 2), dtype=jnp.float32) * 0.5
    b1 = jax.random.normal(kb1, (1,), dtype=jnp.float32) * 0.1
    params = (w2, b2, w1, b1)

    # Weight fusion + lane patterns depend only on params and W: precompute once at
    # load time so the per-forward path is just the single pallas_call (+ bitcast).
    w_eff, bias_eff = fuse_weights(w2, b2, w1, b1)
    fused_ops = make_lane_operands(w_eff, bias_eff, x.shape[-1])
    fwd = jax.jit(lambda xx: fused_conv_transpose_chain(xx, *fused_ops))

    out = jax.block_until_ready(fwd(x))
    assert out.shape == (2, 1, 256, 256), out.shape

    # Correctness vs the unfused pure-JAX reference of the same forward.
    ref = _ref_convt(_ref_convt(x, w2, b2), w1, b1)
    max_err = float(jnp.abs(out - ref).max())
    assert jnp.allclose(out, ref, atol=1e-4, rtol=1e-4), max_err

    print("KERNEL_OK")
</pallas_src>

<mosaic_0001>
module attributes {stable_mosaic.version = 11 : i64} {
  func.func @_fused_deconv_kernel(%arg0: i32, %arg1: i32, %arg2: memref<1x2x64x64xf32, #tpu.memory_space<vmem>>, %arg3: memref<64x1024xf32, #tpu.memory_space<vmem>>, %arg4: memref<2x1024xf32, #tpu.memory_space<vmem>>, %arg5: memref<1x1024xf32, #tpu.memory_space<vmem>>, %arg6: memref<1x1x64x1024xf32, #tpu.memory_space<vmem>>) attributes {dimension_semantics = [#tpu.dimension_semantics<parallel>, #tpu.dimension_semantics<parallel>], iteration_bounds = array<i64: 2, 1>, scalar_prefetch = 0 : i64, scratch_operands = 0 : i64, tpu.core_type = #tpu.core_type<tc>, window_params = [{transform_indices = @transform_0, window_bounds = array<i64: 1, 2, 64, 64>}, {pipeline_mode = #tpu.pipeline_mode<synchronous>, transform_indices = @transform_1, window_bounds = array<i64: 64, 1024>}, {pipeline_mode = #tpu.pipeline_mode<synchronous>, transform_indices = @transform_2, window_bounds = array<i64: 2, 1024>}, {pipeline_mode = #tpu.pipeline_mode<synchronous>, transform_indices = @transform_3, window_bounds = array<i64: 1, 1024>}, {transform_indices = @transform_4, window_bounds = array<i64: 1, 1, 64, 1024>}]} {
    %c0 = arith.constant 0 : index
    %c0_0 = arith.constant 0 : index
    %0 = vector.load %arg3[%c0, %c0_0] : memref<64x1024xf32, #tpu.memory_space<vmem>>, vector<64x1024xf32>
    %c0_1 = arith.constant 0 : index
    %c0_2 = arith.constant 0 : index
    %1 = vector.load %arg5[%c0_1, %c0_2] : memref<1x1024xf32, #tpu.memory_space<vmem>>, vector<1x1024xf32>
    %2 = vector.shape_cast %1 : vector<1x1024xf32> to vector<1x1024xf32>
    %3 = vector.broadcast %2 : vector<1x1024xf32> to vector<64x1024xf32>
    %c0_3 = arith.constant 0 : index
    %c0_4 = arith.constant 0 : index
    %c0_5 = arith.constant 0 : index
    %c0_6 = arith.constant 0 : index
    %4 = vector.load %arg2[%c0_3, %c0_4, %c0_5, %c0_6] : memref<1x2x64x64xf32, #tpu.memory_space<vmem>>, vector<1x1x64x64xf32>
    %5 = vector.shape_cast %4 : vector<1x1x64x64xf32> to vector<64x64xf32>
    %cst = arith.constant dense<0.000000e+00> : vector<64x1024xf32>
    %6 = tpu.matmul %5, %0, %cst {dimension_numbers = #tpu.dot_dimension_numbers<[1], [0], [0], [1], [0, 0, 1, 1], [], []>} : vector<64x64xf32>, vector<64x1024xf32>, vector<64x1024xf32> -> vector<64x1024xf32>
    %c0_7 = arith.constant 0 : index
    %c0_8 = arith.constant 0 : index
    %7 = vector.load %arg4[%c0_7, %c0_8] : memref<2x1024xf32, #tpu.memory_space<vmem>>, vector<1x1024xf32>
    %8 = vector.broadcast %7 : vector<1x1024xf32> to vector<64x1024xf32>
    %9 = arith.mulf %6, %8 : vector<64x1024xf32>
    %10 = arith.addf %3, %9 : vector<64x1024xf32>
    %c0_9 = arith.constant 0 : index
    %c1 = arith.constant 1 : index
    %c0_10 = arith.constant 0 : index
    %c0_11 = arith.constant 0 : index
    %11 = vector.load %arg2[%c0_9, %c1, %c0_10, %c0_11] : memref<1x2x64x64xf32, #tpu.memory_space<vmem>>, vector<1x1x64x64xf32>
    %12 = vector.shape_cast %11 : vector<1x1x64x64xf32> to vector<64x64xf32>
    %cst_12 = arith.constant dense<0.000000e+00> : vector<64x1024xf32>
    %13 = tpu.matmul %12, %0, %cst_12 {dimension_numbers = #tpu.dot_dimension_numbers<[1], [0], [0], [1], [0, 0, 1, 1], [], []>} : vector<64x64xf32>, vector<64x1024xf32>, vector<64x1024xf32> -> vector<64x1024xf32>
    %c1_13 = arith.constant 1 : index
    %c0_14 = arith.constant 0 : index
    %14 = vector.load %arg4[%c1_13, %c0_14] : memref<2x1024xf32, #tpu.memory_space<vmem>>, vector<1x1024xf32>
    %15 = vector.broadcast %14 : vector<1x1024xf32> to vector<64x1024xf32>
    %16 = arith.mulf %13, %15 : vector<64x1024xf32>
    %17 = arith.addf %10, %16 : vector<64x1024xf32>
    %c0_15 = arith.constant 0 : index
    %c0_16 = arith.constant 0 : index
    %c0_17 = arith.constant 0 : index
    %c0_18 = arith.constant 0 : index
    %18 = vector.load %arg6[%c0_15, %c0_16, %c0_17, %c0_18] : memref<1x1x64x1024xf32, #tpu.memory_space<vmem>>, vector<1x1x64x1024xf32>
    %19 = vector.shape_cast %18 : vector<1x1x64x1024xf32> to vector<64x1024xf32>
    %20 = vector.shape_cast %17 : vector<64x1024xf32> to vector<1x1x64x1024xf32>
    tpu.vector_store %arg6[%c0_15, %c0_16, %c0_17, %c0_18], %20 {strides = array<i32>} : memref<1x1x64x1024xf32, #tpu.memory_space<vmem>>, vector<1x1x64x1024xf32>,
    return
  }
  func.func @transform_0(%arg0: i32, %arg1: i32) -> (i32, i32, i32, i32) {
    %c0_i32 = arith.constant 0 : i32
    %c0_i32_0 = arith.constant 0 : i32
    %c0_i32_1 = arith.constant 0 : i32
    return %arg0, %c0_i32, %arg1, %c0_i32_0 : i32, i32, i32, i32
  }
  func.func @transform_1(%arg0: i32, %arg1: i32) -> (i32, i32) {
    %c0_i32 = arith.constant 0 : i32
    %c0_i32_0 = arith.constant 0 : i32
    %c0_i32_1 = arith.constant 0 : i32
    return %c0_i32, %c0_i32_0 : i32, i32
  }
  func.func @transform_2(%arg0: i32, %arg1: i32) -> (i32, i32) {
    %c0_i32 = arith.constant 0 : i32
    %c0_i32_0 = arith.constant 0 : i32
    %c0_i32_1 = arith.constant 0 : i32
    return %c0_i32, %c0_i32_0 : i32, i32
  }
  func.func @transform_3(%arg0: i32, %arg1: i32) -> (i32, i32) {
    %c0_i32 = arith.constant 0 : i32
    %c0_i32_0 = arith.constant 0 : i32
    %c0_i32_1 = arith.constant 0 : i32
    return %c0_i32, %c0_i32_0 : i32, i32
  }
  func.func @transform_4(%arg0: i32, %arg1: i32) -> (i32, i32, i32, i32) {
    %c0_i32 = arith.constant 0 : i32
    %c0_i32_0 = arith.constant 0 : i32
    %c0_i32_1 = arith.constant 0 : i32
    return %arg0, %c0_i32, %arg1, %c0_i32_0 : i32, i32, i32, i32
  }
}

</mosaic_0001>

<bundles_post_ra>
// kernel: _lambda_.1
= control target key start
LH: loop header
LB: loop body
LE: loop exit
PB: predicated region body
PF: predicated region fallthrough
CT: control target
= control target key end

     0   :  { %9 = vsyncpa [#allocation3], 0  ;;  %s3269_s0 = inlined_call_operand.hbm [shape: f32[2,2,64,64], index: 0, kind: input, shape index: {}]   ;;  %s3270_s1 = inlined_call_operand.hbm [shape: f32[64,1024], index: 1, kind: input, shape index: {}]   ;;  %s3271_s2 = inlined_call_operand.hbm [shape: f32[2,1024], index: 2, kind: input, shape index: {}]   ;;  %s3272_s3 = inlined_call_operand.hbm [shape: f32[1,1024], index: 3, kind: input, shape index: {}]   ;;  %s3273_s4 = inlined_call_operand.vmem [shape: f32[2,1,64,1024], index: 4, kind: output, shape index: {}]  }
   0x1   :  { %11 = vsyncpa [#allocation3 + $0x1], 0 }
   0x2   :  { %12 = vsyncpa [#allocation5], 0 }
   0x3   :  { %13 = vsyncpa [#allocation8], 0  ;;  %s2046_s15 = smov 0   ;;  %s2048_s16 = smov 0  }
   0x4   :  { %s2050_s17 = smov 0   ;;  %s2052_s18 = smov 0  }
   0x5   :  { %s2054_s19 = smov 0   ;;  %s2056_s20 = smov 0  }
   0x6 LB: > { %s1587_s21 = sadd.s32 4294967295, %s2012_s20   ;;  %p53_p0 = scmp.ne.s32.totalorder %s1996_s16, %s1992_s15  ;;  %s2012_s20 = sphi %s2056_s20, %s19_s20   ;;  %s2008_s19 = sphi %s2054_s19, %s3353_s19   ;;  %s2004_s18 = sphi %s2052_s18, %s3352_s18   ;;  %s2000_s17 = sphi %s2050_s17, %s3351_s17   ;;  %s1996_s16 = sphi %s2048_s16, %s3350_s16   ;;  %s1992_s15 = sphi %s2046_s15, %s3349_s15  }
   0x7   : > { %p2076_p1 = scmp.eq.s32.totalorder %s1587_s21, 0  ;;  %p1589_p2 = scmp.ge.s32.totalorder %s2012_s20, 1 }
   0x8   : > { %p155_p3 = scmp.lt.s32.totalorder %s2012_s20, 3  ;;  %s166_s26 = sshll.u32 %s3270_s1, 4  ;;  %s167_s26 = int_to_ptr.hbm [resolvable:$true] %s166_s26 }
   0x9   : > { %p2084_p4 = por %p2076_p1, %p53_p0  ;;  %s2014_s28 = smov [#allocation4]  }
   0xa   : > { %p2091_p5 = pnand %p1589_p2, %p155_p3  ;;  %s168_s29 = sshll.u32 %s2014_s28, 4  ;;  %s169_s29 = int_to_ptr.vmem [resolvable:$true] %s168_s29 }
   0xb   : > { %s181_s7 = sshll.u32 %s3271_s2, 4  ;;  %s2015_s8 = smov 1024   ;;  %s182_s7 = int_to_ptr.hbm [resolvable:$true] %s181_s7 }
   0xc   : > { %p1758_p6 = pneg %p2091_p5  ;;  %s2016_s9 = smov 64  }
   0xd   : > { %s2017_s10 = smov [#allocation6]   ;;  %s193_s14 = sshll.u32 %s3272_s3, 4  ;;  %s194_s14 = int_to_ptr.hbm [resolvable:$true] %s193_s14 }
   0xe   : > { %p2099_p7 = pnand %p1758_p6, %p2076_p1  ;;  %s183_s11 = sshll.u32 %s2017_s10, 4  ;;  %s184_s11 = int_to_ptr.vmem [resolvable:$true] %s183_s11 }
   0xf   : > { %s2018_s15 = smov [#allocation7]   ;;  %s31_s24 = sadd.s32 1, %s2008_s19 }
  0x10   : > { %1761 = dma.hbm_to_vmem [thread:$0]  (!%p2099_p7), %s167_s26, 8192, %s169_s29, [#allocation5], %s2015_s8, %s2015_s8, %s2016_s9  }
  0x11   : > { %1764 = dma.hbm_to_vmem [thread:$0]  (!%p2099_p7), %s182_s7, 256, %s184_s11, [#allocation5]  }
  0x12   : > { %s195_s21 = sshll.u32 %s2018_s15, 4  ;;  %p33_p8 = scmp.ge.s32.totalorder %s31_s24, 2  ;;  %s196_s21 = int_to_ptr.vmem [resolvable:$true] %s195_s21 }
  0x13   : > { %1767 = dma.hbm_to_vmem [thread:$0]  (!%p2099_p7), %s194_s14, 128, %s196_s21, [#allocation8]  }
  0x14   : > { %s40_s25 = sadd.s32 1, %s2000_s17  ;;  %p47_p9 = scmp.ne.s32.totalorder %s2000_s17, %s1996_s16 }
  0x15   : > { %p48_p10 = scmp.eq.s32.totalorder %s2012_s20, 0  ;;  %s3355_s24 = smov (%p33_p8, %s31_s24), 0 }
  0x16   : > { %p1775_p12 = scmp.lt.s32.totalorder %s2012_s20, 2  ;;  %s35_s28 = ssub.s32 %s2008_s19, %s3355_s24 }
  0x17   : > { %p2122_p11 = por %p48_p10, %p47_p9  ;;  %s206_s29 = sand.u32 1, %s2000_s17  }
  0x18   : > { %p38_p13 = scmp.eq.s32.totalorder %s35_s28, 0  ;;  %s1594_s30 = sshll.u32 %s206_s29, 7 }
  0x19   : > { %s1742_s5 = sshll.u32 %s2008_s19, 7  ;;  %s210_s11 = scalar_lea.vmem [#allocation2], %s1594_s30 }
  0x1a   : > { %s2132_s6 = scalar_select %p38_p13, %s2000_s17, %s40_s25  }
  0x1b   : > { %s217_s9 = scalar_lea.hbm %s3269_s0, %s1742_s5  ;;  %s220_s12 = sshll.u32 %s210_s11, 4  ;;  %s221_s12 = int_to_ptr.vmem [resolvable:$true] %s220_s12 }
  0x1c   : > { %s218_s10 = sshll.u32 %s217_s9, 4  ;;  %p1769_p0 = pnand %p1775_p12, %p2122_p11  ;;  %s219_s10 = int_to_ptr.hbm [resolvable:$true] %s218_s10 }
  0x1d   : > { %s207_s13 = scalar_lea.sflag [#allocation3], %s206_s29  ;;  %s2019_s14 = smov 128  }
  0x1e   : > { %s2020_s15 = smov 8   ;;  %232 = sbr.rel (%p2091_p5) target bundleno = 447 (0x1bf), region = 36 }
  0x1f   : > { %1771 = dma.hbm_to_vmem [thread:$0]  (!%p1769_p0), %s219_s10, 2048, %s221_s12, %s207_s13, %s2019_s14, %s2019_s14, %s2020_s15  }
  0x23   : > { %s234_s21 = sand.u32 1, %s1996_s16  }
  0x24   : > { %s1598_s25 = sshll.u32 %s234_s21, 7  ;;  %s235_s28 = scalar_lea.sflag [#allocation3], %s234_s21 }
  0x25   : > { %s2144_s5 = scalar_lea.vmem [#allocation2], %s1598_s25 }
  0x26   : > { %1979 = dma.done.wait (%p2084_p4), %s235_s28, 2048  }
  0x27   : > { %1981 = vsyncadd (%p2084_p4), %s235_s28, 4294965248 }
  0x28   : > { %1983 = dma.done.wait (%p2076_p1), [#allocation5], 8448  }
  0x29   : > { %1985 = vsyncadd (%p2076_p1), [#allocation5], 4294958848 }
  0x2a   : > { %1987 = dma.done.wait (%p2076_p1), [#allocation8], 128  }
  0x2b   : > { %1989 = vsyncadd (%p2076_p1), [#allocation8], 4294967168  ;;  %v2158_v0 = vld [vmem:[#allocation4 + $0x1c0] sm:$0xff]  ;;  %v2160_v1 = vld [vmem:[#allocation4 + $0x1c8] sm:$0xff]  ;;  %vm386_vm0 = vcmask 523264   ;;  %p286_p1 = scmp.lt.s32.totalorder %s2004_s18, 1 }
  0x2c   : > { %v2162_v2 = vld [vmem:[#allocation4 + $0x1d0] sm:$0xff]  ;;  %419 = vmatpush.msra.mxu0 %v2158_v0  ;;  %460 = vmatpush.msra.mxu1 %v2160_v1  ;;  %v2166_v3 = vld [vmem:[#allocation4 + $0x1d8] sm:$0xff]  ;;  %v2168_v4 = vld [vmem:[#allocation4 + $0x180] sm:$0xff] }
  0x2d   : > { %v2170_v5 = vld [vmem:[#allocation4 + $0x188] sm:$0xff]  ;;  %501 = vmatpush.msra.mxu2 %v2162_v2  ;;  %542 = vmatpush.msra.mxu3 %v2166_v3  ;;  %v2174_v6 = vld [vmem:[#allocation4 + $0x190] sm:$0xff]  ;;  %v2176_v7 = vld [vmem:[#allocation4 + $0x198] sm:$0xff]  ;;  %s3357_s18 = smov (!%p286_p1, %s2004_s18), 1 }
  0x2e   : > { %v2178_v8 = vld [vmem:[#allocation4 + $0x140] sm:$0xff]  ;;  %420 = vmatpush.msra.mxu0 %v2168_v4  ;;  %461 = vmatpush.msra.mxu1 %v2170_v5  ;;  %v2182_v9 = vld [vmem:[#allocation4 + $0x148] sm:$0xff]  ;;  %v2184_v10 = vld [vmem:[#allocation4 + $0x150] sm:$0xff]  ;;  %s1743_s22 = sshll.u32 %s3357_s18, 9 }
  0x2f   : > { %v2186_v11 = vld [vmem:[#allocation4 + $0x158] sm:$0xff]  ;;  %502 = vmatpush.msra.mxu2 %v2174_v6  ;;  %543 = vmatpush.msra.mxu3 %v2176_v7  ;;  %v2190_v12 = vld [vmem:[#allocation4 + $0x100] sm:$0xff]  ;;  %v2192_v13 = vld [vmem:[#allocation4 + $0x108] sm:$0xff]  ;;  %s2889_s18 = scalar_lea.vmem %s3273_s4, %s1743_s22 }
  0x30   : > { %421 = vmatpush.msra.mxu0 %v2178_v8  ;;  %462 = vmatpush.msra.mxu1 %v2182_v9  ;;  %v2196_v14 = vld [vmem:[#allocation4 + $0x110] sm:$0xff]  ;;  %v2198_v15 = vld [vmem:[#allocation4 + $0x118] sm:$0xff]  ;;  %v2202_v16 = vld [vmem:[#allocation4 + $0xc0] sm:$0xff] }
  0x31   : > { %503 = vmatpush.msra.mxu2 %v2184_v10  ;;  %544 = vmatpush.msra.mxu3 %v2186_v11  ;;  %v2204_v17 = vld [vmem:[#allocation4 + $0xc8] sm:$0xff]  ;;  %v2208_v18 = vld [vmem:[#allocation4 + $0xd0] sm:$0xff]  ;;  %v2210_v19 = vld [vmem:[#allocation4 + $0xd8] sm:$0xff] }
  0x32   : > { %422 = vmatpush.msra.mxu0 %v2190_v12  ;;  %463 = vmatpush.msra.mxu1 %v2192_v13  ;;  %v2214_v20 = vld [vmem:[#allocation4 + $0x80] sm:$0xff]  ;;  %v2216_v21 = vld [vmem:[#allocation4 + $0x88] sm:$0xff]  ;;  %v2220_v22 = vld [vmem:[#allocation4 + $0x90] sm:$0xff] }
  0x33   : > { %504 = vmatpush.msra.mxu2 %v2196_v14  ;;  %545 = vmatpush.msra.mxu3 %v2198_v15  ;;  %v2222_v23 = vld [vmem:[#allocation4 + $0x98] sm:$0xff]  ;;  %v2226_v24 = vld [vmem:[#allocation4 + $0x40] sm:$0xff]  ;;  %v2228_v25 = vld [vmem:[#allocation4 + $0x48] sm:$0xff] }
  0x34   : > { %423 = vmatpush.msra.mxu0 %v2202_v16  ;;  %464 = vmatpush.msra.mxu1 %v2204_v17  ;;  %v2232_v26 = vld [vmem:[#allocation4 + $0x50] sm:$0xff]  ;;  %v2234_v27 = vld [vmem:[#allocation4 + $0x58] sm:$0xff]  ;;  %v2238_v28 = vld [vmem:[#allocation4] sm:$0xff] }
  0x35   : > { %505 = vmatpush.msra.mxu2 %v2208_v18  ;;  %546 = vmatpush.msra.mxu3 %v2210_v19  ;;  %v2240_v29 = vld [vmem:[#allocation4 + $0x8] sm:$0xff]  ;;  %v2244_v30 = vld [vmem:[#allocation4 + $0x10] sm:$0xff]  ;;  %v2246_v31 = vld [vmem:[#allocation4 + $0x18] sm:$0xff] }
  0x36   : > { %424 = vmatpush.msra.mxu0 %v2214_v20  ;;  %465 = vmatpush.msra.mxu1 %v2216_v21  ;;  %v2251_v32 = vld [vmem:[%s2144_s5] sm:$0xff]  ;;  %v2257_v33 = vld [vmem:[#allocation4 + $0x1f0] sm:$0xff]  ;;  %v2259_v34 = vld [vmem:[#allocation4 + $0x1f8] sm:$0xff] }
  0x37   : > { %506 = vmatpush.msra.mxu2 %v2220_v22  ;;  %547 = vmatpush.msra.mxu3 %v2222_v23  ;;  %v2265_v35 = vld [vmem:[#allocation4 + $0x1e0] sm:$0xff]  ;;  %v2267_v36 = vld [vmem:[#allocation4 + $0x1e8] sm:$0xff]  ;;  %v2273_v37 = vld [vmem:[#allocation4 + $0x1b0] sm:$0xff] }
  0x38   : > { %425 = vmatpush.msra.mxu0 %v2226_v24  ;;  %466 = vmatpush.msra.mxu1 %v2228_v25  ;;  %v2275_v38 = vld [vmem:[#allocation4 + $0x1b8] sm:$0xff]  ;;  %v2279_v39 = vld [vmem:[#allocation4 + $0x1a0] sm:$0xff]  ;;  %v2281_v40 = vld [vmem:[#allocation4 + $0x1a8] sm:$0xff] }
  0x39   : > { %507 = vmatpush.msra.mxu2 %v2232_v26  ;;  %548 = vmatpush.msra.mxu3 %v2234_v27  ;;  %v2285_v41 = vld [vmem:[#allocation4 + $0x170] sm:$0xff]  ;;  %v2287_v42 = vld [vmem:[#allocation4 + $0x178] sm:$0xff]  ;;  %v2291_v43 = vld [vmem:[#allocation4 + $0x160] sm:$0xff] }
  0x3a   : > { %426 = vmatpush.msra.mxu0 %v2238_v28  ;;  %467 = vmatpush.msra.mxu1 %v2240_v29  ;;  %v2293_v44 = vld [vmem:[#allocation4 + $0x168] sm:$0xff]  ;;  %v2304_v46 = vld [vmem:[#allocation4 + $0x130] sm:$0xff]  ;;  %v2306_v47 = vld [vmem:[#allocation4 + $0x138] sm:$0xff] }
  0x3b   : > { %508 = vmatpush.msra.mxu2 %v2244_v30  ;;  %549 = vmatpush.msra.mxu3 %v2246_v31  ;;  %v2296_v45 = vld [vmem:[%s2144_s5 + $0x8] sm:$0xff]  ;;  %v2312_v48 = vld [vmem:[#allocation4 + $0x120] sm:$0xff]  ;;  %v2320_v50 = vld [vmem:[#allocation4 + $0xf0] sm:$0xff] }
  0x3c   : > { %1604 = vmatmul.msk.f32.vlgmr.msra.gmra.mxu0 %vm386_vm0, %v2251_v32  ;;  %1612 = vmatmul.msk.f32.vlgmr.msra.gmra.mxu1 %vm386_vm0, %v2251_v32  ;;  %v2314_v49 = vld [vmem:[#allocation4 + $0x128] sm:$0xff]  ;;  %v2322_v51 = vld [vmem:[#allocation4 + $0xf8] sm:$0xff]  ;;  %v2326_v52 = vld [vmem:[#allocation4 + $0xe0] sm:$0xff] }
  0x3d   : > { %1620 = vmatmul.msk.f32.vlgmr.msra.gmra.mxu2 %vm386_vm0, %v2251_v32  ;;  %1628 = vmatmul.msk.f32.vlgmr.msra.gmra.mxu3 %vm386_vm0, %v2251_v32  ;;  %v2328_v53 = vld [vmem:[#allocation4 + $0xe8] sm:$0xff]  ;;  %v2332_v54 = vld [vmem:[#allocation4 + $0xb0] sm:$0xff]  ;;  %v2334_v55 = vld [vmem:[#allocation4 + $0xb8] sm:$0xff] }
  0x3e   : > { %665 = vmatpush.msrb.mxu2 %v2257_v33  ;;  %706 = vmatpush.msrb.mxu3 %v2259_v34  ;;  %v2338_v56 = vld [vmem:[#allocation4 + $0xa0] sm:$0xff]  ;;  %v2340_v57 = vld [vmem:[#allocation4 + $0xa8] sm:$0xff]  ;;  %v2343_v58 = vld [vmem:[%s2144_s5 + $0x10] sm:$0xff] }
  0x3f   : > { %583 = vmatpush.msrb.mxu0 %v2265_v35  ;;  %624 = vmatpush.msrb.mxu1 %v2267_v36  ;;  %v2359_v59 = vld [vmem:[#allocation4 + $0x70] sm:$0xff]  ;;  %v2361_v60 = vld [vmem:[#allocation4 + $0x78] sm:$0xff]  ;;  %v2363_v61 = vld [vmem:[#allocation4 + $0x60] sm:$0xff] }
  0x40   : > { %666 = vmatpush.msrb.mxu2 %v2273_v37  ;;  %707 = vmatpush.msrb.mxu3 %v2275_v38  ;;  %3285 = vst [vmem:[#allocation12_spill] sm:$0xff] %v2359_v59  ;;  %v2367_v62 = vld [vmem:[#allocation4 + $0x68] sm:$0xff]  ;;  %v2372_v63 = vld [vmem:[%s2144_s5 + $0x18] sm:$0xff] }
  0x41   : > { %584 = vmatpush.msrb.mxu0 %v2279_v39  ;;  %625 = vmatpush.msrb.mxu1 %v2281_v40  ;;  %3286 = vst [vmem:[#allocation13_spill] sm:$0xff] %v2361_v60 }
  0x42   : > { %667 = vmatpush.msrb.mxu2 %v2285_v41  ;;  %708 = vmatpush.msrb.mxu3 %v2287_v42  ;;  %3287 = vst [vmem:[#allocation14_spill] sm:$0xff] %v2363_v61 }
  0x43   : > { %585 = vmatpush.msrb.mxu0 %v2291_v43  ;;  %626 = vmatpush.msrb.mxu1 %v2293_v44  ;;  %3288 = vst [vmem:[#allocation15_spill] sm:$0xff] %v2367_v62 }
  0x44   : > { %1605 = vmatmul.msk.f32.gmra.mxu0 %vm386_vm0, %v2296_v45  ;;  %1613 = vmatmul.msk.f32.gmra.mxu1 %vm386_vm0, %v2296_v45  ;;  %3289 = vst [vmem:[#allocation16_spill] sm:$0xff] %v2372_v63 }
  0x45   : > { %1621 = vmatmul.msk.f32.gmra.mxu2 %vm386_vm0, %v2296_v45  ;;  %1629 = vmatmul.msk.f32.gmra.mxu3 %vm386_vm0, %v2296_v45 }
  0x46   : > { %668 = vmatpush.msrb.mxu2 %v2304_v46  ;;  %709 = vmatpush.msrb.mxu3 %v2306_v47 }
  0x47   : > { %586 = vmatpush.msrb.mxu0 %v2312_v48  ;;  %627 = vmatpush.msrb.mxu1 %v2314_v49 }
  0x48   : > { %669 = vmatpush.msrb.mxu2 %v2320_v50  ;;  %710 = vmatpush.msrb.mxu3 %v2322_v51 }
  0x49   : > { %587 = vmatpush.msrb.mxu0 %v2326_v52  ;;  %628 = vmatpush.msrb.mxu1 %v2328_v53 }
  0x4a   : > { %670 = vmatpush.msrb.mxu2 %v2332_v54  ;;  %711 = vmatpush.msrb.mxu3 %v2334_v55 }
  0x4b   : > { %588 = vmatpush.msrb.mxu0 %v2338_v56  ;;  %629 = vmatpush.msrb.mxu1 %v2340_v57 }
  0x4c   : > { %1606 = vmatmul.msk.f32.gmra.mxu0 %vm386_vm0, %v2343_v58  ;;  %1614 = vmatmul.msk.f32.gmra.mxu1 %vm386_vm0, %v2343_v58 }
  0x4d   : > { %1622 = vmatmul.msk.f32.gmra.mxu2 %vm386_vm0, %v2343_v58  ;;  %1630 = vmatmul.msk.f32.gmra.mxu3 %vm386_vm0, %v2343_v58 }
  0x4e   : > { %671 = vmatpush.msrb.mxu2 %v2359_v59  ;;  %712 = vmatpush.msrb.mxu3 %v2361_v60  ;;  %v2382_v60 = vld [vmem:[#allocation4 + $0x30] sm:$0xff]  ;;  %v2390_v59 = vld [vmem:[#allocation4 + $0x28] sm:$0xff] }
  0x4f   : > { %589 = vmatpush.msrb.mxu0 %v2363_v61  ;;  %630 = vmatpush.msrb.mxu1 %v2367_v62  ;;  %v2384_v61 = vld [vmem:[#allocation4 + $0x38] sm:$0xff]  ;;  %v2386_v62 = vld [vmem:[#allocation4 + $0x20] sm:$0xff] }
  0x50   : > { %672 = vmatpush.msrb.mxu2 %v2382_v60  ;;  %713 = vmatpush.msrb.mxu3 %v2384_v61 }
  0x51   : > { %590 = vmatpush.msrb.mxu0 %v2386_v62  ;;  %631 = vmatpush.msrb.mxu1 %v2390_v59 }
  0x52   : > { %1008 = vmatpush.msra.mxu2 %v2162_v2  ;;  %1049 = vmatpush.msra.mxu3 %v2166_v3  ;;  %v2460_v2 = vld [vmem:[%s2144_s5 + $0x38] sm:$0xff] }
  0x53   : > { %926 = vmatpush.msra.mxu0 %v2158_v0  ;;  %967 = vmatpush.msra.mxu1 %v2160_v1  ;;  %v2420_v0 = vld [vmem:[%s2144_s5 + $0x28] sm:$0xff]  ;;  %v2443_v1 = vld [vmem:[%s2144_s5 + $0x30] sm:$0xff]  ;;  %v3290_v3 = vld [vmem:[#allocation12_spill] sm:$0xff] }
  0x54   : > { %1607 = vmatmul.msk.f32.gmra.mxu0 %vm386_vm0, %v2372_v63  ;;  %1615 = vmatmul.msk.f32.gmra.mxu1 %vm386_vm0, %v2372_v63 }
  0x55   : > { %1623 = vmatmul.msk.f32.gmra.mxu2 %vm386_vm0, %v2372_v63  ;;  %1631 = vmatmul.msk.f32.gmra.mxu3 %vm386_vm0, %v2372_v63  ;;  %v2397_v63 = vld [vmem:[%s2144_s5 + $0x20] sm:$0xff] }
  0x56   : > { %1009 = vmatpush.msra.mxu2 %v2174_v6  ;;  %1050 = vmatpush.msra.mxu3 %v2176_v7  ;;  %v3293_v6 = vld [vmem:[#allocation15_spill] sm:$0xff]  ;;  %v3294_v7 = vld [vmem:[#allocation16_spill] sm:$0xff] }
  0x57   : > { %927 = vmatpush.msra.mxu0 %v2168_v4  ;;  %968 = vmatpush.msra.mxu1 %v2170_v5  ;;  %v3291_v4 = vld [vmem:[#allocation13_spill] sm:$0xff]  ;;  %v3292_v5 = vld [vmem:[#allocation14_spill] sm:$0xff] }
  0x58   : > { %1010 = vmatpush.msra.mxu2 %v2184_v10  ;;  %1051 = vmatpush.msra.mxu3 %v2186_v11  ;;  %v2571_v10 = vld [vmem:[%s2144_s5 + $0x40] sm:$0xff] }
  0x59   : > { %928 = vmatpush.msra.mxu0 %v2178_v8  ;;  %969 = vmatpush.msra.mxu1 %v2182_v9 }
  0x5a   : > { %1011 = vmatpush.msra.mxu2 %v2196_v14  ;;  %1052 = vmatpush.msra.mxu3 %v2198_v15  ;;  %v2590_v15 = vld [vmem:[%s2144_s5 + $0x48] sm:$0xff] }
  0x5b   : > { %929 = vmatpush.msra.mxu0 %v2190_v12  ;;  %970 = vmatpush.msra.mxu1 %v2192_v13 }
  0x5c   : > { %1608 = vmatmul.msk.f32.gmra.mxu0 %vm386_vm0, %v2397_v63  ;;  %1616 = vmatmul.msk.f32.gmra.mxu1 %vm386_vm0, %v2397_v63 }
  0x5d   : > { %1624 = vmatmul.msk.f32.gmra.mxu2 %vm386_vm0, %v2397_v63  ;;  %1632 = vmatmul.msk.f32.gmra.mxu3 %vm386_vm0, %v2397_v63 }
  0x5e   : > { %1012 = vmatpush.msra.mxu2 %v2208_v18  ;;  %1053 = vmatpush.msra.mxu3 %v2210_v19 }
  0x5f   : > { %930 = vmatpush.msra.mxu0 %v2202_v16  ;;  %971 = vmatpush.msra.mxu1 %v2204_v17 }
  0x60   : > { %1013 = vmatpush.msra.mxu2 %v2220_v22  ;;  %1054 = vmatpush.msra.mxu3 %v2222_v23 }
  0x61   : > { %931 = vmatpush.msra.mxu0 %v2214_v20  ;;  %972 = vmatpush.msra.mxu1 %v2216_v21  ;;  %v2609_v20 = vld [vmem:[%s2144_s5 + $0x50] sm:$0xff] }
  0x62   : > { %1014 = vmatpush.msra.mxu2 %v2232_v26  ;;  %1055 = vmatpush.msra.mxu3 %v2234_v27 }
  0x63   : > { %932 = vmatpush.msra.mxu0 %v2226_v24  ;;  %973 = vmatpush.msra.mxu1 %v2228_v25  ;;  %v2628_v25 = vld [vmem:[%s2144_s5 + $0x58] sm:$0xff] }
  0x64   : > { %1609 = vmatmul.msk.f32.gmra.mxu0 %vm386_vm0, %v2420_v0  ;;  %1617 = vmatmul.msk.f32.gmra.mxu1 %vm386_vm0, %v2420_v0 }
  0x65   : > { %1625 = vmatmul.msk.f32.gmra.mxu2 %vm386_vm0, %v2420_v0  ;;  %1633 = vmatmul.msk.f32.gmra.mxu3 %vm386_vm0, %v2420_v0 }
  0x66   : > { %1015 = vmatpush.msra.mxu2 %v2244_v30  ;;  %1056 = vmatpush.msra.mxu3 %v2246_v31  ;;  %v2647_v30 = vld [vmem:[%s2144_s5 + $0x60] sm:$0xff] }
  0x67   : > { %933 = vmatpush.msra.mxu0 %v2238_v28  ;;  %974 = vmatpush.msra.mxu1 %v2240_v29 }
  0x6c   : > { %1610 = vmatmul.msk.f32.gmra.mxu0 %vm386_vm0, %v2443_v1  ;;  %1618 = vmatmul.msk.f32.gmra.mxu1 %vm386_vm0, %v2443_v1 }
  0x6d   : > { %1626 = vmatmul.msk.f32.gmra.mxu2 %vm386_vm0, %v2443_v1  ;;  %1634 = vmatmul.msk.f32.gmra.mxu3 %vm386_vm0, %v2443_v1 }
  0x74   : > { %1611 = vmatmul.msk.f32.gmra.mxu0 %vm386_vm0, %v2460_v2  ;;  %1619 = vmatmul.msk.f32.gmra.mxu1 %vm386_vm0, %v2460_v2 }
  0x75   : > { %1627 = vmatmul.msk.f32.gmra.mxu2 %vm386_vm0, %v2460_v2  ;;  %1635 = vmatmul.msk.f32.gmra.mxu3 %vm386_vm0, %v2460_v2 }
  0x7c   : > { %1636 = vmatmul.msk.f32.vlgmr.msrb.gmra.mxu0 %vm386_vm0, %v2251_v32  ;;  %1644 = vmatmul.msk.f32.vlgmr.msrb.gmra.mxu1 %vm386_vm0, %v2251_v32 }
  0x7d   : > { %1652 = vmatmul.msk.f32.vlgmr.msrb.gmra.mxu2 %vm386_vm0, %v2251_v32  ;;  %1660 = vmatmul.msk.f32.vlgmr.msrb.gmra.mxu3 %vm386_vm0, %v2251_v32 }
  0x7e   : > { %1172 = vmatpush.msrb.mxu2 %v2257_v33  ;;  %1213 = vmatpush.msrb.mxu3 %v2259_v34 }
  0x7f   : > { %1090 = vmatpush.msrb.mxu0 %v2265_v35  ;;  %1131 = vmatpush.msrb.mxu1 %v2267_v36  ;;  %v2666_v35 = vld [vmem:[%s2144_s5 + $0x68] sm:$0xff] }
  0x80   : > { %1173 = vmatpush.msrb.mxu2 %v2273_v37  ;;  %1214 = vmatpush.msrb.mxu3 %v2275_v38 }
  0x81   : > { %1091 = vmatpush.msrb.mxu0 %v2279_v39  ;;  %1132 = vmatpush.msrb.mxu1 %v2281_v40  ;;  %v2685_v40 = vld [vmem:[%s2144_s5 + $0x70] sm:$0xff] }
  0x82   : > { %1174 = vmatpush.msrb.mxu2 %v2285_v41  ;;  %1215 = vmatpush.msrb.mxu3 %v2287_v42 }
  0x83   : > { %1092 = vmatpush.msrb.mxu0 %v2291_v43  ;;  %1133 = vmatpush.msrb.mxu1 %v2293_v44 }
  0x84   : > { %1637 = vmatmul.msk.f32.gmra.mxu0 %vm386_vm0, %v2296_v45  ;;  %1645 = vmatmul.msk.f32.gmra.mxu1 %vm386_vm0, %v2296_v45 }
  0x85   : > { %1653 = vmatmul.msk.f32.gmra.mxu2 %vm386_vm0, %v2296_v45  ;;  %1661 = vmatmul.msk.f32.gmra.mxu3 %vm386_vm0, %v2296_v45  ;;  %v2704_v45 = vld [vmem:[%s2144_s5 + $0x78] sm:$0xff] }
  0x86   : > { %1175 = vmatpush.msrb.mxu2 %v2304_v46  ;;  %1216 = vmatpush.msrb.mxu3 %v2306_v47 }
  0x87   : > { %1093 = vmatpush.msrb.mxu0 %v2312_v48  ;;  %1134 = vmatpush.msrb.mxu1 %v2314_v49 }
  0x88   : > { %1176 = vmatpush.msrb.mxu2 %v2320_v50  ;;  %1217 = vmatpush.msrb.mxu3 %v2322_v51 }
  0x89   : > { %1094 = vmatpush.msrb.mxu0 %v2326_v52  ;;  %1135 = vmatpush.msrb.mxu1 %v2328_v53 }
  0x8a   : > { %1177 = vmatpush.msrb.mxu2 %v2332_v54  ;;  %1218 = vmatpush.msrb.mxu3 %v2334_v55 }
  0x8b   : > { %1095 = vmatpush.msrb.mxu0 %v2338_v56  ;;  %1136 = vmatpush.msrb.mxu1 %v2340_v57 }
  0x8c   : > { %1638 = vmatmul.msk.f32.gmra.mxu0 %vm386_vm0, %v2343_v58  ;;  %1646 = vmatmul.msk.f32.gmra.mxu1 %vm386_vm0, %v2343_v58 }
  0x8d   : > { %1654 = vmatmul.msk.f32.gmra.mxu2 %vm386_vm0, %v2343_v58  ;;  %1662 = vmatmul.msk.f32.gmra.mxu3 %vm386_vm0, %v2343_v58 }
  0x8e   : > { %1178 = vmatpush.msrb.mxu2 %v3290_v3  ;;  %1219 = vmatpush.msrb.mxu3 %v3291_v4 }
  0x8f   : > { %1096 = vmatpush.msrb.mxu0 %v3292_v5  ;;  %1137 = vmatpush.msrb.mxu1 %v3293_v6 }
  0x90   : > { %1179 = vmatpush.msrb.mxu2 %v2382_v60  ;;  %1220 = vmatpush.msrb.mxu3 %v2384_v61 }
  0x91   : > { %1097 = vmatpush.msrb.mxu0 %v2386_v62  ;;  %1138 = vmatpush.msrb.mxu1 %v2390_v59 }
  0x94   : > { %1639 = vmatmul.msk.f32.gmra.mxu0 %vm386_vm0, %v3294_v7  ;;  %1647 = vmatmul.msk.f32.gmra.mxu1 %vm386_vm0, %v3294_v7 }
  0x95   : > { %1655 = vmatmul.msk.f32.gmra.mxu2 %vm386_vm0, %v3294_v7  ;;  %1663 = vmatmul.msk.f32.gmra.mxu3 %vm386_vm0, %v3294_v7 }
  0x9c   : > { %1640 = vmatmul.msk.f32.gmra.mxu0 %vm386_vm0, %v2397_v63  ;;  %1648 = vmatmul.msk.f32.gmra.mxu1 %vm386_vm0, %v2397_v63 }
  0x9d   : > { %1656 = vmatmul.msk.f32.gmra.mxu2 %vm386_vm0, %v2397_v63  ;;  %1664 = vmatmul.msk.f32.gmra.mxu3 %vm386_vm0, %v2397_v63 }
  0xa4   : > { %1641 = vmatmul.msk.f32.gmra.mxu0 %vm386_vm0, %v2420_v0  ;;  %1649 = vmatmul.msk.f32.gmra.mxu1 %vm386_vm0, %v2420_v0 }
  0xa5   : > { %1657 = vmatmul.msk.f32.gmra.mxu2 %vm386_vm0, %v2420_v0  ;;  %1665 = vmatmul.msk.f32.gmra.mxu3 %vm386_vm0, %v2420_v0 }
  0xac   : > { %1642 = vmatmul.msk.f32.gmra.mxu0 %vm386_vm0, %v2443_v1  ;;  %1650 = vmatmul.msk.f32.gmra.mxu1 %vm386_vm0, %v2443_v1 }
  0xad   : > { %1658 = vmatmul.msk.f32.gmra.mxu2 %vm386_vm0, %v2443_v1  ;;  %1666 = vmatmul.msk.f32.gmra.mxu3 %vm386_vm0, %v2443_v1 }
  0xb4   : > { %1643 = vmatmul.msk.f32.gmra.mxu0 %vm386_vm0, %v2460_v2  ;;  %1651 = vmatmul.msk.f32.gmra.mxu1 %vm386_vm0, %v2460_v2 }
  0xb5   : > { %1659 = vmatmul.msk.f32.gmra.mxu2 %vm386_vm0, %v2460_v2  ;;  %1667 = vmatmul.msk.f32.gmra.mxu3 %vm386_vm0, %v2460_v2 }
  0xb9   : > { %v2566_v8 = vpop.f32.mrf.mxu0  ;;  %v2568_v9 = vpop.f32.mrf.mxu1 }
  0xbc   : > { %1676 = vmatmul.msk.f32.vlgmr.msra.gmra.mxu0 %vm386_vm0, %v2571_v10  ;;  %1684 = vmatmul.msk.f32.vlgmr.msra.gmra.mxu1 %vm386_vm0, %v2571_v10 }
  0xbd   : > { %1692 = vmatmul.msk.f32.vlgmr.msra.gmra.mxu2 %vm386_vm0, %v2571_v10  ;;  %1700 = vmatmul.msk.f32.vlgmr.msra.gmra.mxu3 %vm386_vm0, %v2571_v10 }
  0xc0   : > { %v2581_v11 = vpop.f32.mrf.mxu2  ;;  %v2583_v12 = vpop.f32.mrf.mxu3 }
  0xc1   : > { %v2585_v13 = vpop.f32.mrf.mxu0  ;;  %v2587_v14 = vpop.f32.mrf.mxu1 }
  0xc4   : > { %1677 = vmatmul.msk.f32.gmra.mxu0 %vm386_vm0, %v2590_v15  ;;  %1685 = vmatmul.msk.f32.gmra.mxu1 %vm386_vm0, %v2590_v15 }
  0xc5   : > { %1693 = vmatmul.msk.f32.gmra.mxu2 %vm386_vm0, %v2590_v15  ;;  %1701 = vmatmul.msk.f32.gmra.mxu3 %vm386_vm0, %v2590_v15 }
  0xc8   : > { %v2600_v16 = vpop.f32.mrf.mxu2  ;;  %v2602_v17 = vpop.f32.mrf.mxu3 }
  0xc9   : > { %v2604_v18 = vpop.f32.mrf.mxu0  ;;  %v2606_v19 = vpop.f32.mrf.mxu1 }
  0xcc   : > { %1678 = vmatmul.msk.f32.gmra.mxu0 %vm386_vm0, %v2609_v20  ;;  %1686 = vmatmul.msk.f32.gmra.mxu1 %vm386_vm0, %v2609_v20 }
  0xcd   : > { %1694 = vmatmul.msk.f32.gmra.mxu2 %vm386_vm0, %v2609_v20  ;;  %1702 = vmatmul.msk.f32.gmra.mxu3 %vm386_vm0, %v2609_v20 }
  0xd0   : > { %v2619_v21 = vpop.f32.mrf.mxu2  ;;  %v2621_v22 = vpop.f32.mrf.mxu3 }
  0xd1   : > { %v2623_v23 = vpop.f32.mrf.mxu0  ;;  %v2625_v24 = vpop.f32.mrf.mxu1 }
  0xd4   : > { %1679 = vmatmul.msk.f32.gmra.mxu0 %vm386_vm0, %v2628_v25  ;;  %1687 = vmatmul.msk.f32.gmra.mxu1 %vm386_vm0, %v2628_v25 }
  0xd5   : > { %1695 = vmatmul.msk.f32.gmra.mxu2 %vm386_vm0, %v2628_v25  ;;  %1703 = vmatmul.msk.f32.gmra.mxu3 %vm386_vm0, %v2628_v25 }
  0xd8   : > { %v2638_v26 = vpop.f32.mrf.mxu2  ;;  %v2640_v27 = vpop.f32.mrf.mxu3 }
  0xd9   : > { %v2642_v28 = vpop.f32.mrf.mxu0  ;;  %v2644_v29 = vpop.f32.mrf.mxu1 }
  0xdc   : > { %1680 = vmatmul.msk.f32.gmra.mxu0 %vm386_vm0, %v2647_v30  ;;  %1688 = vmatmul.msk.f32.gmra.mxu1 %vm386_vm0, %v2647_v30 }
  0xdd   : > { %1696 = vmatmul.msk.f32.gmra.mxu2 %vm386_vm0, %v2647_v30  ;;  %1704 = vmatmul.msk.f32.gmra.mxu3 %vm386_vm0, %v2647_v30 }
  0xe0   : > { %v2657_v31 = vpop.f32.mrf.mxu2  ;;  %v2659_v32 = vpop.f32.mrf.mxu3 }
  0xe1   : > { %v2661_v33 = vpop.f32.mrf.mxu0  ;;  %v2663_v34 = vpop.f32.mrf.mxu1 }
  0xe4   : > { %1681 = vmatmul.msk.f32.gmra.mxu0 %vm386_vm0, %v2666_v35  ;;  %1689 = vmatmul.msk.f32.gmra.mxu1 %vm386_vm0, %v2666_v35 }
  0xe5   : > { %1697 = vmatmul.msk.f32.gmra.mxu2 %vm386_vm0, %v2666_v35  ;;  %1705 = vmatmul.msk.f32.gmra.mxu3 %vm386_vm0, %v2666_v35 }
  0xe8   : > { %v2676_v36 = vpop.f32.mrf.mxu2  ;;  %v2678_v37 = vpop.f32.mrf.mxu3 }
  0xe9   : > { %v2680_v38 = vpop.f32.mrf.mxu0  ;;  %v2682_v39 = vpop.f32.mrf.mxu1 }
  0xec   : > { %1682 = vmatmul.msk.f32.gmra.mxu0 %vm386_vm0, %v2685_v40  ;;  %1690 = vmatmul.msk.f32.gmra.mxu1 %vm386_vm0, %v2685_v40 }
  0xed   : > { %1698 = vmatmul.msk.f32.gmra.mxu2 %vm386_vm0, %v2685_v40  ;;  %1706 = vmatmul.msk.f32.gmra.mxu3 %vm386_vm0, %v2685_v40 }
  0xf0   : > { %v2695_v41 = vpop.f32.mrf.mxu2  ;;  %v2697_v42 = vpop.f32.mrf.mxu3 }
  0xf1   : > { %v2699_v43 = vpop.f32.mrf.mxu0  ;;  %v2701_v44 = vpop.f32.mrf.mxu1 }
  0xf4   : > { %1683 = vmatmul.msk.f32.gmra.mxu0 %vm386_vm0, %v2704_v45  ;;  %1691 = vmatmul.msk.f32.gmra.mxu1 %vm386_vm0, %v2704_v45 }
  0xf5   : > { %1699 = vmatmul.msk.f32.gmra.mxu2 %vm386_vm0, %v2704_v45  ;;  %1707 = vmatmul.msk.f32.gmra.mxu3 %vm386_vm0, %v2704_v45 }
  0xf8   : > { %v2714_v46 = vpop.f32.mrf.mxu2  ;;  %v2716_v47 = vpop.f32.mrf.mxu3 }
  0xf9   : > { %v2718_v48 = vpop.f32.mrf.mxu0  ;;  %v2720_v49 = vpop.f32.mrf.mxu1 }
  0xfc   : > { %1708 = vmatmul.msk.f32.vlgmr.msrb.gmra.mxu0 %vm386_vm0, %v2571_v10  ;;  %1716 = vmatmul.msk.f32.vlgmr.msrb.gmra.mxu1 %vm386_vm0, %v2571_v10 }
  0xfd   : > { %1724 = vmatmul.msk.f32.vlgmr.msrb.gmra.mxu2 %vm386_vm0, %v2571_v10  ;;  %1732 = vmatmul.msk.f32.vlgmr.msrb.gmra.mxu3 %vm386_vm0, %v2571_v10 }
 0x100   : > { %v2730_v50 = vpop.f32.mrf.mxu2  ;;  %v2732_v51 = vpop.f32.mrf.mxu3 }
 0x101   : > { %v2734_v52 = vpop.f32.mrf.mxu0  ;;  %v2736_v53 = vpop.f32.mrf.mxu1 }
 0x102   : > { %3295 = vst [vmem:[#allocation12_spill] sm:$0xff] %v2736_v53 }
 0x104   : > { %1709 = vmatmul.msk.f32.gmra.mxu0 %vm386_vm0, %v2590_v15  ;;  %1717 = vmatmul.msk.f32.gmra.mxu1 %vm386_vm0, %v2590_v15 }
 0x105   : > { %1725 = vmatmul.msk.f32.gmra.mxu2 %vm386_vm0, %v2590_v15  ;;  %1733 = vmatmul.msk.f32.gmra.mxu3 %vm386_vm0, %v2590_v15 }
 0x108   : > { %v2746_v54 = vpop.f32.mrf.mxu2  ;;  %v2748_v55 = vpop.f32.mrf.mxu3 }
 0x109   : > { %3296 = vst [vmem:[#allocation13_spill] sm:$0xff] %v2746_v54  ;;  %v2750_v56 = vpop.f32.mrf.mxu0  ;;  %v2752_v57 = vpop.f32.mrf.mxu1 }
 0x10a   : > { %3297 = vst [vmem:[#allocation14_spill] sm:$0xff] %v2748_v55 }
 0x10b   : > { %3298 = vst [vmem:[#allocation15_spill] sm:$0xff] %v2750_v56 }
 0x10c   : > { %3299 = vst [vmem:[#allocation16_spill] sm:$0xff] %v2752_v57  ;;  %1710 = vmatmul.msk.f32.gmra.mxu0 %vm386_vm0, %v2609_v20  ;;  %1718 = vmatmul.msk.f32.gmra.mxu1 %vm386_vm0, %v2609_v20 }
 0x10d   : > { %1726 = vmatmul.msk.f32.gmra.mxu2 %vm386_vm0, %v2609_v20  ;;  %1734 = vmatmul.msk.f32.gmra.mxu3 %vm386_vm0, %v2609_v20  ;;  %v2826_v20 = vld [vmem:[#allocation6] ss:$2 sm:$0xff] }
 0x110   : > { %v2762_v58 = vpop.f32.mrf.mxu2  ;;  %v2764_v59 = vpop.f32.mrf.mxu3 }
 0x111   : > { %3300 = vst [vmem:[#allocation17_spill] sm:$0xff] %v2762_v58  ;;  %v2766_v60 = vpop.f32.mrf.mxu0  ;;  %v2768_v61 = vpop.f32.mrf.mxu1 }
 0x112   : > { %3301 = vst [vmem:[#allocation18_spill] sm:$0xff] %v2764_v59 }
 0x113   : > { %3302 = vst [vmem:[#allocation19_spill] sm:$0xff] %v2766_v60 }
 0x114   : > { %3303 = vst [vmem:[#allocation20_spill] sm:$0xff] %v2768_v61  ;;  %1711 = vmatmul.msk.f32.gmra.mxu0 %vm386_vm0, %v2628_v25  ;;  %1719 = vmatmul.msk.f32.gmra.mxu1 %vm386_vm0, %v2628_v25 }
 0x115   : > { %1727 = vmatmul.msk.f32.gmra.mxu2 %vm386_vm0, %v2628_v25  ;;  %1735 = vmatmul.msk.f32.gmra.mxu3 %vm386_vm0, %v2628_v25 }
 0x118   : > { %v2778_v62 = vpop.f32.mrf.mxu2  ;;  %v2780_v63 = vpop.f32.mrf.mxu3 }
 0x119   : > { %3304 = vst [vmem:[#allocation21_spill] sm:$0xff] %v2778_v62  ;;  %v2782_v0 = vpop.f32.mrf.mxu0  ;;  %v2784_v1 = vpop.f32.mrf.mxu1 }
 0x11a   : > { %3305 = vst [vmem:[#allocation22_spill] sm:$0xff] %v2780_v63 }
 0x11b   : > { %3306 = vst [vmem:[#allocation23_spill] sm:$0xff] %v2782_v0 }
 0x11c   : > { %3307 = vst [vmem:[#allocation24_spill] sm:$0xff] %v2784_v1  ;;  %1712 = vmatmul.msk.f32.gmra.mxu0 %vm386_vm0, %v2647_v30  ;;  %1720 = vmatmul.msk.f32.gmra.mxu1 %vm386_vm0, %v2647_v30  ;;  %v2877_v1 = vperm.slane %v2826_v20, 2 }
 0x11d   : > { %1728 = vmatmul.msk.f32.gmra.mxu2 %vm386_vm0, %v2647_v30  ;;  %1736 = vmatmul.msk.f32.gmra.mxu3 %vm386_vm0, %v2647_v30 }
 0x120   : > { %v2794_v2 = vpop.f32.mrf.mxu2  ;;  %v2796_v3 = vpop.f32.mrf.mxu3 }
 0x121   : > { %3308 = vst [vmem:[#allocation25_spill] sm:$0xff] %v2794_v2  ;;  %v2798_v4 = vpop.f32.mrf.mxu0  ;;  %v2800_v5 = vpop.f32.mrf.mxu1 }
 0x122   : > { %3309 = vst [vmem:[#allocation26_spill] sm:$0xff] %v2796_v3 }
 0x123   : > { %3310 = vst [vmem:[#allocation27_spill] sm:$0xff] %v2798_v4 }
 0x124   : > { %3311 = vst [vmem:[#allocation28_spill] sm:$0xff] %v2800_v5  ;;  %1713 = vmatmul.msk.f32.gmra.mxu0 %vm386_vm0, %v2666_v35  ;;  %1721 = vmatmul.msk.f32.gmra.mxu1 %vm386_vm0, %v2666_v35 }
 0x125   : > { %1729 = vmatmul.msk.f32.gmra.mxu2 %vm386_vm0, %v2666_v35  ;;  %1737 = vmatmul.msk.f32.gmra.mxu3 %vm386_vm0, %v2666_v35 }
 0x128   : > { %v2810_v6 = vpop.f32.mrf.mxu2  ;;  %v2812_v7 = vpop.f32.mrf.mxu3 }
 0x129   : > { %3312 = vst [vmem:[#allocation29_spill] sm:$0xff] %v2810_v6  ;;  %v2814_v10 = vpop.f32.mrf.mxu0  ;;  %v2816_v15 = vpop.f32.mrf.mxu1  ;;  %v2843_v6 = vperm.slane %v2826_v20, 1 }
 0x12a   : > { %3313 = vst [vmem:[#allocation30_spill] sm:$0xff] %v2812_v7  ;;  %v2840_v7 = vperm.slane %v2826_v20, 0 }
 0x12b   : > { %3314 = vst [vmem:[#allocation31_spill] sm:$0xff] %v2814_v10  ;;  %v2837_v10 = vld [vmem:[#allocation7] sm:$0xff]  ;;  %v766_v57 = vmul.f32 %v2843_v6, %v2587_v14 }
 0x12c   : > { %3315 = vst [vmem:[#allocation32_spill] sm:$0xff] %v2816_v15  ;;  %1714 = vmatmul.msk.f32.gmra.mxu0 %vm386_vm0, %v2685_v40  ;;  %1722 = vmatmul.msk.f32.gmra.mxu1 %vm386_vm0, %v2685_v40  ;;  %v765_v58 = vmul.f32 %v2840_v7, %v2585_v13 }
 0x12d   : > { %1730 = vmatmul.msk.f32.gmra.mxu2 %vm386_vm0, %v2685_v40  ;;  %1738 = vmatmul.msk.f32.gmra.mxu3 %vm386_vm0, %v2685_v40  ;;  %v2845_v40 = vld [vmem:[#allocation6 + $0x1] ss:$2 sm:$0xff] }
 0x12e   : > { %v2867_v5 = vperm.slane %v2845_v40, 0  ;;  %v2870_v4 = vperm.slane %v2845_v40, 1  ;;  %v2905_v59 = vperm.slane %v2845_v40, 3 }
 0x130   : > { %v2828_v25 = vpop.f32.mrf.mxu2  ;;  %v2830_v30 = vpop.f32.mrf.mxu3 }
 0x131   : > { %3316 = vst [vmem:[#allocation33_spill] sm:$0xff] %v2828_v25  ;;  %v2833_v35 = vpop.f32.mrf.mxu0  ;;  %v2835_v15 = vpop.f32.mrf.mxu1  ;;  %v758_v25 = vmul.f32 %v2843_v6, %v2568_v9 }
 0x132   : > { %3317 = vst [vmem:[#allocation34_spill] sm:$0xff] %v2830_v30  ;;  %v757_v30 = vmul.f32 %v2840_v7, %v2566_v8 }
 0x133   : > { %3318 = vst [vmem:[#allocation35_spill] sm:$0xff] %v2833_v35  ;;  %v2853_v35 = vperm.slane %v2837_v10, 0 }
 0x134   : > { %3319 = vst [vmem:[#allocation36_spill] sm:$0xff] %v2835_v15  ;;  %1715 = vmatmul.msk.f32.gmra.mxu0 %vm386_vm0, %v2704_v45  ;;  %1723 = vmatmul.msk.f32.gmra.mxu1 %vm386_vm0, %v2704_v45  ;;  %v2856_v15 = vperm.slane %v2837_v10, 1 }
 0x135   : > { %1731 = vmatmul.msk.f32.gmra.mxu2 %vm386_vm0, %v2704_v45  ;;  %1739 = vmatmul.msk.f32.gmra.mxu3 %vm386_vm0, %v2704_v45  ;;  %v2880_v45 = vperm.slane %v2826_v20, 3  ;;  %v821_v9 = vadd.f32 %v757_v30, %v2853_v35  ;;  %v829_v14 = vadd.f32 %v765_v58, %v2853_v35  ;;  %v773_v58 = vmul.f32 %v2840_v7, %v2604_v18 }
 0x136   : > { %v822_v63 = vadd.f32 %v758_v25, %v2856_v15  ;;  %v759_v25 = vmul.f32 %v2877_v1, %v2581_v11 }
 0x138   : > { %v2872_v3 = vpop.f32.mrf.mxu2  ;;  %v2874_v2 = vpop.f32.mrf.mxu3 }
 0x139   : > { %3320 = vst [vmem:[#allocation37_spill] sm:$0xff] %v2872_v3  ;;  %v935_v8 = vpop.f32.mrf.mxu0  ;;  %v976_v0 = vpop.f32.mrf.mxu1  ;;  %v2895_v3 = vperm.slane %v2837_v10, 3 }
 0x13a   : > { %3321 = vst [vmem:[#allocation38_spill] sm:$0xff] %v2874_v2  ;;  %v1265_v62 = vmul.f32 %v2867_v5, %v935_v8  ;;  %v1266_v61 = vmul.f32 %v2870_v4, %v976_v0  ;;  %v2892_v2 = vperm.slane %v2837_v10, 2  ;;  %v760_v0 = vmul.f32 %v2880_v45, %v2583_v12 }
 0x13b   : > { %v2902_v8 = vperm.slane %v2845_v40, 2 }
 0x13c   : > { %v1329_v30 = vadd.f32 %v1265_v62, %v821_v9  ;;  %v1330_v60 = vadd.f32 %v1266_v61, %v822_v63  ;;  %v823_v11 = vadd.f32 %v759_v25, %v2892_v2  ;;  %v824_v12 = vadd.f32 %v760_v0, %v2895_v3 }
 0x13e   : > { %1393 = vst [vmem:[%s2889_s18] sm:$0xff] %v1329_v30 }
 0x13f   : > { %1394 = vst [vmem:[%s2889_s18 + $0x8] sm:$0xff] %v1330_v60  ;;  %v830_v60 = vadd.f32 %v766_v57, %v2856_v15  ;;  %v774_v57 = vmul.f32 %v2843_v6, %v2606_v19  ;;  %v837_v19 = vadd.f32 %v773_v58, %v2853_v35 }
 0x140   : > { %v1017_v61 = vpop.f32.mrf.mxu2  ;;  %v1058_v62 = vpop.f32.mrf.mxu3 }
 0x141   : > { %v1267_v63 = vmul.f32 %v2902_v8, %v1017_v61  ;;  %v1268_v9 = vmul.f32 %v2905_v59, %v1058_v62  ;;  %v938_v56 = vpop.f32.mrf.mxu0  ;;  %v979_v13 = vpop.f32.mrf.mxu1  ;;  %v767_v61 = vmul.f32 %v2877_v1, %v2600_v16  ;;  %v768_v62 = vmul.f32 %v2880_v45, %v2602_v17 }
 0x142   : > { %v1273_v30 = vmul.f32 %v2867_v5, %v938_v56  ;;  %v1274_v25 = vmul.f32 %v2870_v4, %v979_v13 }
 0x143   : > { %v1331_v55 = vadd.f32 %v1267_v63, %v823_v11  ;;  %v1332_v54 = vadd.f32 %v1268_v9, %v824_v12  ;;  %v831_v12 = vadd.f32 %v767_v61, %v2892_v2  ;;  %v832_v16 = vadd.f32 %v768_v62, %v2895_v3 }
 0x144   : > { %v1337_v0 = vadd.f32 %v1273_v30, %v829_v14  ;;  %v1338_v53 = vadd.f32 %v1274_v25, %v830_v60  ;;  %v775_v25 = vmul.f32 %v2877_v1, %v2619_v21  ;;  %v781_v61 = vmul.f32 %v2840_v7, %v2623_v23 }
 0x145   : > { %1395 = vst [vmem:[%s2889_s18 + $0x10] sm:$0xff] %v1331_v55  ;;  %v782_v62 = vmul.f32 %v2843_v6, %v2625_v24 }
 0x146   : > { %1396 = vst [vmem:[%s2889_s18 + $0x18] sm:$0xff] %v1332_v54  ;;  %v845_v24 = vadd.f32 %v781_v61, %v2853_v35 }
 0x147   : > { %1401 = vst [vmem:[%s2889_s18 + $0x40] sm:$0xff] %v1337_v0  ;;  %v776_v0 = vmul.f32 %v2880_v45, %v2621_v22 }
 0x148   : > { %1402 = vst [vmem:[%s2889_s18 + $0x48] sm:$0xff] %v1338_v53  ;;  %v1020_v56 = vpop.f32.mrf.mxu2  ;;  %v1061_v11 = vpop.f32.mrf.mxu3  ;;  %v838_v53 = vadd.f32 %v774_v57, %v2856_v15 }
 0x149   : > { %v1275_v63 = vmul.f32 %v2902_v8, %v1020_v56  ;;  %v1276_v17 = vmul.f32 %v2905_v59, %v1061_v11  ;;  %v941_v55 = vpop.f32.mrf.mxu0  ;;  %v982_v18 = vpop.f32.mrf.mxu1  ;;  %v839_v56 = vadd.f32 %v775_v25, %v2892_v2  ;;  %v840_v21 = vadd.f32 %v776_v0, %v2895_v3 }
 0x14a   : > { %v1281_v54 = vmul.f32 %v2867_v5, %v941_v55  ;;  %v1282_v9 = vmul.f32 %v2870_v4, %v982_v18 }
 0x14b   : > { %v1339_v13 = vadd.f32 %v1275_v63, %v831_v12  ;;  %v1340_v14 = vadd.f32 %v1276_v17, %v832_v16  ;;  %v846_v16 = vadd.f32 %v782_v62, %v2856_v15 }
 0x14c   : > { %v1345_v60 = vadd.f32 %v1281_v54, %v837_v19  ;;  %v1346_v30 = vadd.f32 %v1282_v9, %v838_v53  ;;  %v783_v54 = vmul.f32 %v2877_v1, %v2638_v26  ;;  %v784_v9 = vmul.f32 %v2880_v45, %v2640_v27 }
 0x14d   : > { %1403 = vst [vmem:[%s2889_s18 + $0x50] sm:$0xff] %v1339_v13  ;;  %v789_v13 = vmul.f32 %v2840_v7, %v2642_v28 }
 0x14e   : > { %1404 = vst [vmem:[%s2889_s18 + $0x58] sm:$0xff] %v1340_v14  ;;  %v790_v14 = vmul.f32 %v2843_v6, %v2644_v29  ;;  %v847_v25 = vadd.f32 %v783_v54, %v2892_v2  ;;  %v848_v26 = vadd.f32 %v784_v9, %v2895_v3 }
 0x14f   : > { %1409 = vst [vmem:[%s2889_s18 + $0x80] sm:$0xff] %v1345_v60  ;;  %v853_v29 = vadd.f32 %v789_v13, %v2853_v35 }
 0x150   : > { %1410 = vst [vmem:[%s2889_s18 + $0x88] sm:$0xff] %v1346_v30  ;;  %v1023_v58 = vpop.f32.mrf.mxu2  ;;  %v1064_v57 = vpop.f32.mrf.mxu3  ;;  %v854_v62 = vadd.f32 %v790_v14, %v2856_v15 }
 0x151   : > { %v1283_v11 = vmul.f32 %v2902_v8, %v1023_v58  ;;  %v1284_v22 = vmul.f32 %v2905_v59, %v1064_v57  ;;  %v944_v12 = vpop.f32.mrf.mxu0  ;;  %v985_v23 = vpop.f32.mrf.mxu1 }
 0x152   : > { %v1289_v63 = vmul.f32 %v2867_v5, %v944_v12  ;;  %v1290_v17 = vmul.f32 %v2870_v4, %v985_v23  ;;  %v791_v12 = vmul.f32 %v2877_v1, %v2657_v31  ;;  %v792_v23 = vmul.f32 %v2880_v45, %v2659_v32 }
 0x153   : > { %v1347_v55 = vadd.f32 %v1283_v11, %v839_v56  ;;  %v1348_v18 = vadd.f32 %v1284_v22, %v840_v21 }
 0x154   : > { %v1353_v19 = vadd.f32 %v1289_v63, %v845_v24  ;;  %v1354_v53 = vadd.f32 %v1290_v17, %v846_v16  ;;  %v797_v24 = vmul.f32 %v2840_v7, %v2661_v33  ;;  %v798_v16 = vmul.f32 %v2843_v6, %v2663_v34 }
 0x155   : > { %1411 = vst [vmem:[%s2889_s18 + $0x90] sm:$0xff] %v1347_v55  ;;  %v855_v55 = vadd.f32 %v791_v12, %v2892_v2  ;;  %v856_v31 = vadd.f32 %v792_v23, %v2895_v3 }
 0x156   : > { %1412 = vst [vmem:[%s2889_s18 + $0x98] sm:$0xff] %v1348_v18  ;;  %v861_v34 = vadd.f32 %v797_v24, %v2853_v35  ;;  %v807_v24 = vmul.f32 %v2877_v1, %v2695_v41 }
 0x157   : > { %1417 = vst [vmem:[%s2889_s18 + $0xc0] sm:$0xff] %v1353_v19 }
 0x158   : > { %1418 = vst [vmem:[%s2889_s18 + $0xc8] sm:$0xff] %v1354_v53  ;;  %v1026_v60 = vpop.f32.mrf.mxu2  ;;  %v1067_v30 = vpop.f32.mrf.mxu3  ;;  %v862_v53 = vadd.f32 %v798_v16, %v2856_v15  ;;  %v808_v16 = vmul.f32 %v2880_v45, %v2697_v42  ;;  %v871_v42 = vadd.f32 %v807_v24, %v2892_v2 }
 0x159   : > { %v1291_v0 = vmul.f32 %v2902_v8, %v1026_v60  ;;  %v1292_v27 = vmul.f32 %v2905_v59, %v1067_v30  ;;  %v947_v61 = vpop.f32.mrf.mxu0  ;;  %v988_v28 = vpop.f32.mrf.mxu1 }
 0x15a   : > { %v1297_v58 = vmul.f32 %v2867_v5, %v947_v61  ;;  %v1298_v57 = vmul.f32 %v2870_v4, %v988_v28 }
 0x15b   : > { %v1355_v56 = vadd.f32 %v1291_v0, %v847_v25  ;;  %v1356_v21 = vadd.f32 %v1292_v27, %v848_v26  ;;  %v799_v25 = vmul.f32 %v2877_v1, %v2676_v36  ;;  %v800_v26 = vmul.f32 %v2880_v45, %v2678_v37 }
 0x15c   : > { %v1361_v11 = vadd.f32 %v1297_v58, %v853_v29  ;;  %v1362_v22 = vadd.f32 %v1298_v57, %v854_v62  ;;  %v805_v0 = vmul.f32 %v2840_v7, %v2680_v38  ;;  %v806_v27 = vmul.f32 %v2843_v6, %v2682_v39 }
 0x15d   : > { %1419 = vst [vmem:[%s2889_s18 + $0xd0] sm:$0xff] %v1355_v56  ;;  %v863_v29 = vadd.f32 %v799_v25, %v2892_v2  ;;  %v864_v36 = vadd.f32 %v800_v26, %v2895_v3  ;;  %v3064_v25 = vperm.slane %v2845_v40, 4 }
 0x15e   : > { %1420 = vst [vmem:[%s2889_s18 + $0xd8] sm:$0xff] %v1356_v21  ;;  %v869_v39 = vadd.f32 %v805_v0, %v2853_v35  ;;  %v870_v57 = vadd.f32 %v806_v27, %v2856_v15 }
 0x15f   : > { %1425 = vst [vmem:[%s2889_s18 + $0x100] sm:$0xff] %v1361_v11 }
 0x160   : > { %1426 = vst [vmem:[%s2889_s18 + $0x108] sm:$0xff] %v1362_v22  ;;  %v1029_v63 = vpop.f32.mrf.mxu2  ;;  %v1070_v17 = vpop.f32.mrf.mxu3 }
 0x161   : > { %v1299_v18 = vmul.f32 %v2902_v8, %v1029_v63  ;;  %v1300_v32 = vmul.f32 %v2905_v59, %v1070_v17  ;;  %v950_v19 = vpop.f32.mrf.mxu0  ;;  %v991_v33 = vpop.f32.mrf.mxu1  ;;  %v813_v63 = vmul.f32 %v2840_v7, %v2699_v43  ;;  %v814_v17 = vmul.f32 %v2843_v6, %v2701_v44 }
 0x162   : > { %v1305_v54 = vmul.f32 %v2867_v5, %v950_v19  ;;  %v1306_v9 = vmul.f32 %v2870_v4, %v991_v33 }
 0x163   : > { %v1363_v13 = vadd.f32 %v1299_v18, %v855_v55  ;;  %v1364_v14 = vadd.f32 %v1300_v32, %v856_v31  ;;  %v3033_v55 = vperm.slane %v2826_v20, 4  ;;  %v3036_v31 = vperm.slane %v2826_v20, 5 }
 0x164   : > { %v1369_v60 = vadd.f32 %v1305_v54, %v861_v34  ;;  %v1370_v30 = vadd.f32 %v1306_v9, %v862_v53  ;;  %v872_v32 = vadd.f32 %v808_v16, %v2895_v3  ;;  %v877_v19 = vadd.f32 %v813_v63, %v2853_v35 }
 0x165   : > { %1427 = vst [vmem:[%s2889_s18 + $0x110] sm:$0xff] %v1363_v13  ;;  %v878_v33 = vadd.f32 %v814_v17, %v2856_v15  ;;  %v3052_v35 = vperm.slane %v2837_v10, 4  ;;  %v3055_v15 = vperm.slane %v2837_v10, 5 }
 0x166   : > { %1428 = vst [vmem:[%s2889_s18 + $0x118] sm:$0xff] %v1364_v14 }
 0x167   : > { %1433 = vst [vmem:[%s2889_s18 + $0x140] sm:$0xff] %v1369_v60  ;;  %v815_v60 = vmul.f32 %v2877_v1, %v2714_v46  ;;  %v3067_v46 = vperm.slane %v2845_v40, 5  ;;  %v3074_v1 = vperm.slane %v2826_v20, 7 }
 0x168   : > { %1434 = vst [vmem:[%s2889_s18 + $0x148] sm:$0xff] %v1370_v30  ;;  %v1032_v61 = vpop.f32.mrf.mxu2  ;;  %v1073_v28 = vpop.f32.mrf.mxu3  ;;  %v816_v30 = vmul.f32 %v2880_v45, %v2716_v47  ;;  %v3071_v47 = vperm.slane %v2826_v20, 6 }
 0x169   : > { %v1307_v62 = vmul.f32 %v2902_v8, %v1032_v61  ;;  %v1308_v37 = vmul.f32 %v2905_v59, %v1073_v28  ;;  %v953_v58 = vpop.f32.mrf.mxu0  ;;  %v994_v38 = vpop.f32.mrf.mxu1  ;;  %v879_v26 = vadd.f32 %v815_v60, %v2892_v2 }
 0x16a   : > { %v1313_v56 = vmul.f32 %v2867_v5, %v953_v58  ;;  %v1314_v21 = vmul.f32 %v2870_v4, %v994_v38  ;;  %v763_v38 = vmul.f32 %v3071_v47, %v2730_v50 }
 0x16b   : > { %v1371_v11 = vadd.f32 %v1307_v62, %v863_v29  ;;  %v1372_v22 = vadd.f32 %v1308_v37, %v864_v36 }
 0x16c   : > { %v1377_v12 = vadd.f32 %v1313_v56, %v869_v39  ;;  %v1378_v23 = vadd.f32 %v1314_v21, %v870_v57  ;;  %v764_v39 = vmul.f32 %v3074_v1, %v2732_v51  ;;  %v3097_v57 = vperm.slane %v2845_v40, 6 }
 0x16d   : > { %1435 = vst [vmem:[%s2889_s18 + $0x150] sm:$0xff] %v1371_v11  ;;  %v3100_v56 = vperm.slane %v2845_v40, 7  ;;  %v769_v21 = vmul.f32 %v3033_v55, %v2734_v52 }
 0x16e   : > { %1436 = vst [vmem:[%s2889_s18 + $0x158] sm:$0xff] %v1372_v22 }
 0x16f   : > { %1441 = vst [vmem:[%s2889_s18 + $0x180] sm:$0xff] %v1377_v12  ;;  %v833_v16 = vadd.f32 %v769_v21, %v3052_v35 }
 0x170   : > { %1442 = vst [vmem:[%s2889_s18 + $0x188] sm:$0xff] %v1378_v23  ;;  %v1035_v41 = vpop.f32.mrf.mxu2  ;;  %v1076_v18 = vpop.f32.mrf.mxu3 }
 0x171   : > { %v1315_v43 = vmul.f32 %v2902_v8, %v1035_v41  ;;  %v1316_v44 = vmul.f32 %v2905_v59, %v1076_v18  ;;  %v956_v6 = vpop.f32.mrf.mxu0  ;;  %v997_v7 = vpop.f32.mrf.mxu1 }
 0x172   : > { %v1321_v34 = vmul.f32 %v2867_v5, %v956_v6  ;;  %v1322_v53 = vmul.f32 %v2870_v4, %v997_v7  ;;  %v761_v4 = vmul.f32 %v3033_v55, %v2718_v48  ;;  %v762_v5 = vmul.f32 %v3036_v31, %v2720_v49  ;;  %v3324_v7 = vld [vmem:[#allocation14_spill] sm:$0xff] }
 0x173   : > { %v1379_v54 = vadd.f32 %v1315_v43, %v871_v42  ;;  %v1380_v9 = vadd.f32 %v1316_v44, %v872_v32  ;;  %v880_v49 = vadd.f32 %v816_v30, %v2895_v3  ;;  %v3323_v44 = vld [vmem:[#allocation13_spill] sm:$0xff] }
 0x174   : > { %v1385_v13 = vadd.f32 %v1321_v34, %v877_v19  ;;  %v1386_v14 = vadd.f32 %v1322_v53, %v878_v33  ;;  %v825_v29 = vadd.f32 %v761_v4, %v3052_v35  ;;  %v826_v36 = vadd.f32 %v762_v5, %v3055_v15  ;;  %v3325_v33 = vld [vmem:[#allocation15_spill] sm:$0xff]  ;;  %v3326_v53 = vld [vmem:[#allocation16_spill] sm:$0xff] }
 0x175   : > { %1443 = vst [vmem:[%s2889_s18 + $0x190] sm:$0xff] %v1379_v54  ;;  %v771_v6 = vmul.f32 %v3071_v47, %v3323_v44  ;;  %v772_v19 = vmul.f32 %v3074_v1, %v3324_v7  ;;  %v777_v34 = vmul.f32 %v3033_v55, %v3325_v33  ;;  %v778_v54 = vmul.f32 %v3036_v31, %v3326_v53  ;;  %v3333_v44 = vld [vmem:[#allocation23_spill] sm:$0xff]  ;;  %v3334_v7 = vld [vmem:[#allocation24_spill] sm:$0xff] }
 0x176   : > { %1444 = vst [vmem:[%s2889_s18 + $0x198] sm:$0xff] %v1380_v9 }
 0x177   : > { %1449 = vst [vmem:[%s2889_s18 + $0x1c0] sm:$0xff] %v1385_v13 }
 0x178   : > { %1450 = vst [vmem:[%s2889_s18 + $0x1c8] sm:$0xff] %v1386_v14  ;;  %v1038_v45 = vpop.f32.mrf.mxu2  ;;  %v1079_v48 = vpop.f32.mrf.mxu3 }
 0x179   : > { %v1323_v0 = vmul.f32 %v2902_v8, %v1038_v45  ;;  %v1324_v27 = vmul.f32 %v2905_v59, %v1079_v48  ;;  %v1099_v61 = vpop.f32.mrf.mxu0  ;;  %v1140_v28 = vpop.f32.mrf.mxu1  ;;  %v3086_v8 = vperm.slane %v2837_v10, 6  ;;  %v3089_v59 = vperm.slane %v2837_v10, 7  ;;  %v3322_v10 = vld [vmem:[#allocation12_spill] sm:$0xff] }
 0x17a   : > { %v1269_v20 = vmul.f32 %v3064_v25, %v1099_v61  ;;  %v1270_v62 = vmul.f32 %v3067_v46, %v1140_v28  ;;  %v770_v11 = vmul.f32 %v3036_v31, %v3322_v10  ;;  %v841_v48 = vadd.f32 %v777_v34, %v3052_v35 }
 0x17b   : > { %v1387_v2 = vadd.f32 %v1323_v0, %v879_v26  ;;  %v1388_v3 = vadd.f32 %v1324_v27, %v880_v49  ;;  %v827_v51 = vadd.f32 %v763_v38, %v3086_v8  ;;  %v828_v12 = vadd.f32 %v764_v39, %v3089_v59 }
 0x17c   : > { %v1333_v37 = vadd.f32 %v1269_v20, %v825_v29  ;;  %v1334_v58 = vadd.f32 %v1270_v62, %v826_v36  ;;  %v834_v63 = vadd.f32 %v770_v11, %v3055_v15  ;;  %v835_v14 = vadd.f32 %v771_v6, %v3086_v8  ;;  %v3327_v36 = vld [vmem:[#allocation17_spill] sm:$0xff]  ;;  %v3328_v62 = vld [vmem:[#allocation18_spill] sm:$0xff] }
 0x17d   : > { %1451 = vst [vmem:[%s2889_s18 + $0x1d0] sm:$0xff] %v1387_v2  ;;  %v836_v60 = vadd.f32 %v772_v19, %v3089_v59  ;;  %v842_v26 = vadd.f32 %v778_v54, %v3055_v15  ;;  %v779_v20 = vmul.f32 %v3071_v47, %v3327_v36  ;;  %v780_v2 = vmul.f32 %v3074_v1, %v3328_v62  ;;  %v3337_v36 = vld [vmem:[#allocation27_spill] sm:$0xff]  ;;  %v3338_v62 = vld [vmem:[#allocation28_spill] sm:$0xff] }
 0x17e   : > { %1452 = vst [vmem:[%s2889_s18 + $0x1d8] sm:$0xff] %v1388_v3  ;;  %v3329_v3 = vld [vmem:[#allocation19_spill] sm:$0xff]  ;;  %v793_v6 = vmul.f32 %v3033_v55, %v3333_v44  ;;  %v794_v19 = vmul.f32 %v3036_v31, %v3334_v7 }
 0x17f   : > { %1397 = vst [vmem:[%s2889_s18 + $0x20] sm:$0xff] %v1333_v37  ;;  %v785_v37 = vmul.f32 %v3033_v55, %v3329_v3  ;;  %v843_v10 = vadd.f32 %v779_v20, %v3086_v8  ;;  %v844_v11 = vadd.f32 %v780_v2, %v3089_v59  ;;  %v801_v20 = vmul.f32 %v3033_v55, %v3337_v36 }
 0x180   : > { %1398 = vst [vmem:[%s2889_s18 + $0x28] sm:$0xff] %v1334_v58  ;;  %v1181_v50 = vpop.f32.mrf.mxu2  ;;  %v1222_v22 = vpop.f32.mrf.mxu3  ;;  %v3330_v58 = vld [vmem:[#allocation20_spill] sm:$0xff]  ;;  %v802_v2 = vmul.f32 %v3036_v31, %v3338_v62 }
 0x181   : > { %v1271_v23 = vmul.f32 %v3097_v57, %v1181_v50  ;;  %v1272_v40 = vmul.f32 %v3100_v56, %v1222_v22  ;;  %v1102_v24 = vpop.f32.mrf.mxu0  ;;  %v1143_v52 = vpop.f32.mrf.mxu1  ;;  %v786_v38 = vmul.f32 %v3036_v31, %v3330_v58 }
 0x182   : > { %v1277_v17 = vmul.f32 %v3064_v25, %v1102_v24  ;;  %v1278_v41 = vmul.f32 %v3067_v46, %v1143_v52 }
 0x183   : > { %v1335_v18 = vadd.f32 %v1271_v23, %v827_v51  ;;  %v1336_v42 = vadd.f32 %v1272_v40, %v828_v12  ;;  %v849_v23 = vadd.f32 %v785_v37, %v3052_v35  ;;  %v850_v40 = vadd.f32 %v786_v38, %v3055_v15 }
 0x184   : > { %v1341_v32 = vadd.f32 %v1277_v17, %v833_v16  ;;  %v1342_v43 = vadd.f32 %v1278_v41, %v834_v63 }
 0x185   : > { %1399 = vst [vmem:[%s2889_s18 + $0x30] sm:$0xff] %v1335_v18  ;;  %v3331_v18 = vld [vmem:[#allocation21_spill] sm:$0xff] }
 0x186   : > { %1400 = vst [vmem:[%s2889_s18 + $0x38] sm:$0xff] %v1336_v42  ;;  %v787_v42 = vmul.f32 %v3071_v47, %v3331_v18  ;;  %v3341_v18 = vld [vmem:[#allocation31_spill] sm:$0xff] }
 0x187   : > { %1405 = vst [vmem:[%s2889_s18 + $0x60] sm:$0xff] %v1341_v32  ;;  %v3332_v32 = vld [vmem:[#allocation22_spill] sm:$0xff] }
 0x188   : > { %1406 = vst [vmem:[%s2889_s18 + $0x68] sm:$0xff] %v1342_v43  ;;  %v1184_v9 = vpop.f32.mrf.mxu2  ;;  %v1225_v13 = vpop.f32.mrf.mxu3  ;;  %v788_v43 = vmul.f32 %v3074_v1, %v3332_v32  ;;  %v851_v53 = vadd.f32 %v787_v42, %v3086_v8  ;;  %v809_v42 = vmul.f32 %v3033_v55, %v3341_v18  ;;  %v3342_v32 = vld [vmem:[#allocation32_spill] sm:$0xff] }
 0x189   : > { %v1279_v30 = vmul.f32 %v3097_v57, %v1184_v9  ;;  %v1280_v4 = vmul.f32 %v3100_v56, %v1225_v13  ;;  %v1105_v5 = vpop.f32.mrf.mxu0  ;;  %v1146_v45 = vpop.f32.mrf.mxu1 }
 0x18a   : > { %v1285_v49 = vmul.f32 %v3064_v25, %v1105_v5  ;;  %v1286_v0 = vmul.f32 %v3067_v46, %v1146_v45  ;;  %v852_v54 = vadd.f32 %v788_v43, %v3089_v59  ;;  %v810_v43 = vmul.f32 %v3036_v31, %v3342_v32 }
 0x18b   : > { %v1343_v27 = vadd.f32 %v1279_v30, %v835_v14  ;;  %v1344_v61 = vadd.f32 %v1280_v4, %v836_v60  ;;  %v857_v30 = vadd.f32 %v793_v6, %v3052_v35  ;;  %v858_v4 = vadd.f32 %v794_v19, %v3055_v15 }
 0x18c   : > { %v1349_v28 = vadd.f32 %v1285_v49, %v841_v48  ;;  %v1350_v29 = vadd.f32 %v1286_v0, %v842_v26 }
 0x18d   : > { %1407 = vst [vmem:[%s2889_s18 + $0x70] sm:$0xff] %v1343_v27  ;;  %v3335_v27 = vld [vmem:[#allocation25_spill] sm:$0xff] }
 0x18e   : > { %1408 = vst [vmem:[%s2889_s18 + $0x78] sm:$0xff] %v1344_v61  ;;  %v795_v61 = vmul.f32 %v3071_v47, %v3335_v27  ;;  %v3345_v27 = vld [vmem:[#allocation35_spill] sm:$0xff] }
 0x18f   : > { %1413 = vst [vmem:[%s2889_s18 + $0xa0] sm:$0xff] %v1349_v28  ;;  %v3336_v28 = vld [vmem:[#allocation26_spill] sm:$0xff] }
 0x190   : > { %1414 = vst [vmem:[%s2889_s18 + $0xa8] sm:$0xff] %v1350_v29  ;;  %v1187_v39 = vpop.f32.mrf.mxu2  ;;  %v1228_v21 = vpop.f32.mrf.mxu3  ;;  %v796_v29 = vmul.f32 %v3074_v1, %v3336_v28  ;;  %v859_v58 = vadd.f32 %v795_v61, %v3086_v8  ;;  %v817_v61 = vmul.f32 %v3033_v55, %v3345_v27  ;;  %v3346_v28 = vld [vmem:[#allocation36_spill] sm:$0xff] }
 0x191   : > { %v1287_v50 = vmul.f32 %v3097_v57, %v1187_v39  ;;  %v1288_v22 = vmul.f32 %v3100_v56, %v1228_v21  ;;  %v1108_v51 = vpop.f32.mrf.mxu0  ;;  %v1149_v12 = vpop.f32.mrf.mxu1 }
 0x192   : > { %v1293_v24 = vmul.f32 %v3064_v25, %v1108_v51  ;;  %v1294_v52 = vmul.f32 %v3067_v46, %v1149_v12  ;;  %v860_v38 = vadd.f32 %v796_v29, %v3089_v59  ;;  %v818_v29 = vmul.f32 %v3036_v31, %v3346_v28 }
 0x193   : > { %v1351_v16 = vadd.f32 %v1287_v50, %v843_v10  ;;  %v1352_v63 = vadd.f32 %v1288_v22, %v844_v11  ;;  %v865_v50 = vadd.f32 %v801_v20, %v3052_v35  ;;  %v866_v22 = vadd.f32 %v802_v2, %v3055_v15 }
 0x194   : > { %v1357_v17 = vadd.f32 %v1293_v24, %v849_v23  ;;  %v1358_v41 = vadd.f32 %v1294_v52, %v850_v40  ;;  %v881_v31 = vadd.f32 %v817_v61, %v3052_v35 }
 0x195   : > { %1415 = vst [vmem:[%s2889_s18 + $0xb0] sm:$0xff] %v1351_v16  ;;  %v3339_v16 = vld [vmem:[#allocation29_spill] sm:$0xff] }
 0x196   : > { %1416 = vst [vmem:[%s2889_s18 + $0xb8] sm:$0xff] %v1352_v63  ;;  %v803_v63 = vmul.f32 %v3071_v47, %v3339_v16 }
 0x197   : > { %1421 = vst [vmem:[%s2889_s18 + $0xe0] sm:$0xff] %v1357_v17  ;;  %v3340_v17 = vld [vmem:[#allocation30_spill] sm:$0xff] }
 0x198   : > { %1422 = vst [vmem:[%s2889_s18 + $0xe8] sm:$0xff] %v1358_v41  ;;  %v1190_v33 = vpop.f32.mrf.mxu2  ;;  %v1231_v34 = vpop.f32.mrf.mxu3  ;;  %v804_v41 = vmul.f32 %v3074_v1, %v3340_v17  ;;  %v867_v7 = vadd.f32 %v803_v63, %v3086_v8 }
 0x199   : > { %v1295_v9 = vmul.f32 %v3097_v57, %v1190_v33  ;;  %v1296_v13 = vmul.f32 %v3100_v56, %v1231_v34  ;;  %v1111_v14 = vpop.f32.mrf.mxu0  ;;  %v1152_v60 = vpop.f32.mrf.mxu1 }
 0x19a   : > { %v1301_v5 = vmul.f32 %v3064_v25, %v1111_v14  ;;  %v1302_v45 = vmul.f32 %v3067_v46, %v1152_v60  ;;  %v868_v19 = vadd.f32 %v804_v41, %v3089_v59 }
 0x19b   : > { %v1359_v48 = vadd.f32 %v1295_v9, %v851_v53  ;;  %v1360_v26 = vadd.f32 %v1296_v13, %v852_v54  ;;  %v873_v9 = vadd.f32 %v809_v42, %v3052_v35  ;;  %v874_v13 = vadd.f32 %v810_v43, %v3055_v15 }
 0x19c   : > { %v1365_v49 = vadd.f32 %v1301_v5, %v857_v30  ;;  %v1366_v0 = vadd.f32 %v1302_v45, %v858_v4 }
 0x19d   : > { %1423 = vst [vmem:[%s2889_s18 + $0xf0] sm:$0xff] %v1359_v48  ;;  %v3343_v48 = vld [vmem:[#allocation33_spill] sm:$0xff] }
 0x19e   : > { %1424 = vst [vmem:[%s2889_s18 + $0xf8] sm:$0xff] %v1360_v26  ;;  %v811_v26 = vmul.f32 %v3071_v47, %v3343_v48 }
 0x19f   : > { %1429 = vst [vmem:[%s2889_s18 + $0x120] sm:$0xff] %v1365_v49  ;;  %v3344_v49 = vld [vmem:[#allocation34_spill] sm:$0xff] }
 0x1a0   : > { %1430 = vst [vmem:[%s2889_s18 + $0x128] sm:$0xff] %v1366_v0  ;;  %v1193_v3 = vpop.f32.mrf.mxu2  ;;  %v1234_v37 = vpop.f32.mrf.mxu3  ;;  %v812_v0 = vmul.f32 %v3074_v1, %v3344_v49  ;;  %v875_v62 = vadd.f32 %v811_v26, %v3086_v8 }
 0x1a1   : > { %v1303_v39 = vmul.f32 %v3097_v57, %v1193_v3  ;;  %v1304_v21 = vmul.f32 %v3100_v56, %v1234_v37  ;;  %v1114_v10 = vpop.f32.mrf.mxu0  ;;  %v1155_v11 = vpop.f32.mrf.mxu1 }
 0x1a2   : > { %v1309_v51 = vmul.f32 %v3064_v25, %v1114_v10  ;;  %v1310_v12 = vmul.f32 %v3067_v46, %v1155_v11  ;;  %v876_v2 = vadd.f32 %v812_v0, %v3089_v59 }
 0x1a3   : > { %v1367_v23 = vadd.f32 %v1303_v39, %v859_v58  ;;  %v1368_v40 = vadd.f32 %v1304_v21, %v860_v38  ;;  %v882_v38 = vadd.f32 %v818_v29, %v3055_v15 }
 0x1a4   : > { %v1373_v24 = vadd.f32 %v1309_v51, %v865_v50  ;;  %v1374_v52 = vadd.f32 %v1310_v12, %v866_v22  ;;  %v3347_v51 = vld [vmem:[#allocation37_spill] sm:$0xff] }
 0x1a5   : > { %1431 = vst [vmem:[%s2889_s18 + $0x130] sm:$0xff] %v1367_v23  ;;  %v819_v12 = vmul.f32 %v3071_v47, %v3347_v51  ;;  %v3348_v23 = vld [vmem:[#allocation38_spill] sm:$0xff] }
 0x1a6   : > { %1432 = vst [vmem:[%s2889_s18 + $0x138] sm:$0xff] %v1368_v40  ;;  %v820_v40 = vmul.f32 %v3074_v1, %v3348_v23 }
 0x1a7   : > { %1437 = vst [vmem:[%s2889_s18 + $0x160] sm:$0xff] %v1373_v24 }
 0x1a8   : > { %1438 = vst [vmem:[%s2889_s18 + $0x168] sm:$0xff] %v1374_v52  ;;  %v1196_v44 = vpop.f32.mrf.mxu2  ;;  %v1237_v6 = vpop.f32.mrf.mxu3 }
 0x1a9   : > { %v1311_v33 = vmul.f32 %v3097_v57, %v1196_v44  ;;  %v1312_v34 = vmul.f32 %v3100_v56, %v1237_v6  ;;  %v1117_v53 = vpop.f32.mrf.mxu0  ;;  %v1158_v54 = vpop.f32.mrf.mxu1 }
 0x1aa   : > { %v1317_v14 = vmul.f32 %v3064_v25, %v1117_v53  ;;  %v1318_v60 = vmul.f32 %v3067_v46, %v1158_v54 }
 0x1ab   : > { %v1375_v30 = vadd.f32 %v1311_v33, %v867_v7  ;;  %v1376_v4 = vadd.f32 %v1312_v34, %v868_v19 }
 0x1ac   : > { %v1381_v5 = vadd.f32 %v1317_v14, %v873_v9  ;;  %v1382_v45 = vadd.f32 %v1318_v60, %v874_v13 }
 0x1ad   : > { %1439 = vst [vmem:[%s2889_s18 + $0x170] sm:$0xff] %v1375_v30 }
 0x1ae   : > { %1440 = vst [vmem:[%s2889_s18 + $0x178] sm:$0xff] %v1376_v4 }
 0x1af   : > { %1445 = vst [vmem:[%s2889_s18 + $0x1a0] sm:$0xff] %v1381_v5 }
 0x1b0   : > { %1446 = vst [vmem:[%s2889_s18 + $0x1a8] sm:$0xff] %v1382_v45  ;;  %v1199_v36 = vpop.f32.mrf.mxu2  ;;  %v1240_v20 = vpop.f32.mrf.mxu3 }
 0x1b1   : > { %v1319_v3 = vmul.f32 %v3097_v57, %v1199_v36  ;;  %v1320_v37 = vmul.f32 %v3100_v56, %v1240_v20  ;;  %v1120_v55 = vpop.f32.mrf.mxu0  ;;  %v1161_v58 = vpop.f32.mrf.mxu1 }
 0x1b2   : > { %v1325_v39 = vmul.f32 %v3064_v25, %v1120_v55  ;;  %v1326_v21 = vmul.f32 %v3067_v46, %v1161_v58  ;;  %v883_v25 = vadd.f32 %v819_v12, %v3086_v8  ;;  %v884_v46 = vadd.f32 %v820_v40, %v3089_v59 }
 0x1b3   : > { %v1383_v10 = vadd.f32 %v1319_v3, %v875_v62  ;;  %v1384_v11 = vadd.f32 %v1320_v37, %v876_v2 }
 0x1b4   : > { %v1389_v50 = vadd.f32 %v1325_v39, %v881_v31  ;;  %v1390_v22 = vadd.f32 %v1326_v21, %v882_v38 }
 0x1b5   : > { %1447 = vst [vmem:[%s2889_s18 + $0x1b0] sm:$0xff] %v1383_v10 }
 0x1b6   : > { %1448 = vst [vmem:[%s2889_s18 + $0x1b8] sm:$0xff] %v1384_v11 }
 0x1b7   : > { %1453 = vst [vmem:[%s2889_s18 + $0x1e0] sm:$0xff] %v1389_v50 }
 0x1b8   : > { %1454 = vst [vmem:[%s2889_s18 + $0x1e8] sm:$0xff] %v1390_v22  ;;  %v1202_v35 = vpop.f32.mrf.mxu2  ;;  %v1243_v15 = vpop.f32.mrf.mxu3 }
 0x1b9   : > { %v1327_v24 = vmul.f32 %v3097_v57, %v1202_v35  ;;  %v1328_v52 = vmul.f32 %v3100_v56, %v1243_v15 }
 0x1bb   : > { %v1391_v16 = vadd.f32 %v1327_v24, %v883_v25  ;;  %v1392_v63 = vadd.f32 %v1328_v52, %v884_v46 }
 0x1bd   : > { %1455 = vst [vmem:[%s2889_s18 + $0x1f0] sm:$0xff] %v1391_v16 }
 0x1be   : > { %1456 = vst [vmem:[%s2889_s18 + $0x1f8] sm:$0xff] %v1392_v63 }
 0x1bf PF: > { %s19_s20 = sadd.s32 1, %s2012_s20   ;;  %s3349_s15 = smov %s1996_s16 }
 0x1c0   : > { %p16_p2 = scmp.ge.s32.totalorder %s19_s20, 4   ;;  %s3350_s16 = smov %s2000_s17 }
 0x1c1   : > { %s3351_s17 = smov %s2132_s6  ;;  %s3352_s18 = smov %s2008_s19 }
 0x1c2   : > { %s3353_s19 = smov %s3355_s24  ;;  %18 = sbr.rel (!%p16_p2) target bundleno = 6 (0x6), region = 90 }
 0x1c7   :  { %1489 = vsyncpa [#allocation3], 1 }
 0x1c8   :  { %1491 = vsyncpa [#allocation3 + $0x1], 1 }
 0x1c9   :  { %1492 = vsyncpa [#allocation5], 1 }
 0x1ca   :  { %1493 = vsyncpa [#allocation8], 1 }

</bundles_post_ra>
